<compile_context>
chip_gen: v5e
topology: v5e:2x2
jax: 0.10.0
libtpu: 0.0.40
codegen_flags: <defaults>
</compile_context>

<pallas_src>
from functools import partial

import jax
import jax.numpy as jnp
from jax.experimental import pallas as pl
from jax.experimental.pallas import tpu as pltpu


# ----------------------------------------------------------------------------
# Pallas kernels
# ----------------------------------------------------------------------------
def _linear_kernel(x_ref, w_ref, b_ref, o_ref):
    # x: (tm, K) activations (cast to the MXU dtype here),
    # w: (K, Nout) bf16 resident weight, b: (1, Nout) f32, o: (tm, Nout).
    x = x_ref[...].astype(w_ref.dtype)
    acc = jnp.dot(x, w_ref[...], preferred_element_type=jnp.float32)
    o_ref[...] = (acc + b_ref[...].astype(jnp.float32)).astype(o_ref.dtype)


def _attention_kernel(qkv_ref, o_ref, *, heads_per_group, head_dim):
    # qkv_ref block: (1, N, 3, Cg) -- one batch element, one head group.
    # o_ref  block: (1, N, Cg)     -- lane-dense output slab for this group.
    Hg, D = heads_per_group, head_dim
    outs = []
    for h in range(Hg):                       # small static unroll (<= ~6 heads)
        lo, hi = h * D, (h + 1) * D
        q = qkv_ref[0, :, 0, lo:hi]           # (N, D) bf16; scale pre-folded in W
        k = qkv_ref[0, :, 1, lo:hi]
        v = qkv_ref[0, :, 2, lo:hi]
        # scores: contract the last dims directly (no k.T relayout); f32 accum.
        s = jax.lax.dot_general(q, k, (((1,), (1,)), ((), ())),
                                preferred_element_type=jnp.float32)   # (N, N)
        # numerically stable softmax, kept in f32 (mandatory on v5e).
        s = s - jnp.max(s, axis=-1, keepdims=True)
        p = jnp.exp(s)
        inv_l = pl.reciprocal(jnp.sum(p, axis=-1, keepdims=True), approx=True)
        out = jnp.dot(p.astype(v.dtype), v,
                      preferred_element_type=jnp.float32)             # (N, D)
        # Normalize the (N, D) output (N/D fewer VPU multiplies than scaling p).
        outs.append((out * inv_l).astype(o_ref.dtype))
    # Single full-width, lane-dense store for the whole head group.
    o_ref[0] = jnp.concatenate(outs, axis=-1)


# ----------------------------------------------------------------------------
# Wrappers calling pallas_call
# ----------------------------------------------------------------------------
def _vmem_limit(bytes_needed):
    # Never drop below the 32 MiB default scoped limit; add headroom on top of
    # the explicit block budget (stays far below v7x's 64 MiB at ViT scale).
    return max(int(bytes_needed * 1.5) + (1 << 20), 32 * 1024 * 1024)


def pallas_linear(x2d, w_t, b, out_dtype, tm=256):
    """x2d: (M, K); w_t: (K, Nout) pre-transposed; b: (Nout,). Returns (M, Nout).

    Grid only over M; the full weight/bias are VMEM-resident (fetched once per
    call).  tm=256 keeps the MXU full on v6e/v7x (also a 128-multiple for
    v5e); the ragged last M block is handled by pl.cdiv."""
    M, K = x2d.shape
    Nout = w_t.shape[1]
    tm = tm if M >= tm else M                 # full-dim block for small M
    grid = (pl.cdiv(M, tm),)

    needed = (2 * tm * K * x2d.dtype.itemsize           # double-buffered x tile
              + K * Nout * w_t.dtype.itemsize            # resident weight
              + Nout * 4                                 # bias
              + 2 * tm * Nout * jnp.dtype(out_dtype).itemsize)  # output tile
    return pl.pallas_call(
        _linear_kernel,
        out_shape=jax.ShapeDtypeStruct((M, Nout), out_dtype),
        grid=grid,
        in_specs=[
            pl.BlockSpec((tm, K), lambda i: (i, 0)),
            pl.BlockSpec((K, Nout), lambda i: (0, 0)),    # constant -> one DMA
            pl.BlockSpec((1, Nout), lambda i: (0, 0)),
        ],
        out_specs=pl.BlockSpec((tm, Nout), lambda i: (i, 0)),
        compiler_params=pltpu.CompilerParams(
            dimension_semantics=("parallel",),
            vmem_limit_bytes=_vmem_limit(needed)),
    )(x2d, w_t, b.reshape(1, Nout))


def pallas_mha_core(qkv, num_heads, out_dtype):
    """qkv: (B, N, 3, C) (free view of the qkv-linear output).  Returns
    softmax(q k^T) @ v with heads concatenated along channels: (B, N, C)."""
    B, N, _, C = qkv.shape
    H = num_heads
    D = C // H
    # Split heads into 2 groups only if the per-group channel slab stays
    # lane-dense (multiple of 128); two parallel grid axes feed both v7x cores.
    G = 2 if (H % 2 == 0 and (C // 2) % 128 == 0) else 1
    Hg, Cg = H // G, C // G

    needed = (2 * N * 8 * Cg * qkv.dtype.itemsize   # qkv block (sublane 3 -> 8 pad)
              + 2 * N * Cg * jnp.dtype(out_dtype).itemsize   # output block
              + 4 * N * N * 4)                               # f32 scores working set
    return pl.pallas_call(
        partial(_attention_kernel, heads_per_group=Hg, head_dim=D),
        out_shape=jax.ShapeDtypeStruct((B, N, C), out_dtype),
        grid=(B, G),
        in_specs=[pl.BlockSpec((1, N, 3, Cg), lambda b, g: (b, 0, 0, g))],
        out_specs=pl.BlockSpec((1, N, Cg), lambda b, g: (b, 0, g)),
        compiler_params=pltpu.CompilerParams(
            dimension_semantics=("parallel", "parallel"),
            vmem_limit_bytes=_vmem_limit(needed)),
    )(qkv)


def attention_forward(x, params, num_heads):
    """Reproduces Attention.forward (attn/proj dropout ratios are 0 -> identity)."""
    B, N, C = x.shape
    compute_dtype = params["w_qkv_t"].dtype          # bf16 MXU operands

    # qkv = nn.Linear(C, 3C, bias=False)(x); the f32->bf16 cast of x happens
    # inside the kernel tile (no extra HBM round trip).
    qkv = pallas_linear(x.reshape(B * N, C), params["w_qkv_t"],
                        params["b_qkv"], compute_dtype)            # (B*N, 3C)
    qkv = qkv.reshape(B, N, 3, C)                                  # free view

    # softmax(q k^T * scale) @ v written directly in (B, N, C) layout
    # (scale already folded into the q-columns of w_qkv_t at init).
    attn_out = pallas_mha_core(qkv, num_heads, compute_dtype)      # (B, N, C)

    # proj = nn.Linear(C, C); final output in f32.
    out = pallas_linear(attn_out.reshape(B * N, C), params["w_proj_t"],
                        params["b_proj"], jnp.float32)
    return out.reshape(B, N, C)


# ----------------------------------------------------------------------------
# Deterministic parameter init + reference + demo
# ----------------------------------------------------------------------------
def init_params(key, dim, num_heads, dtype=jnp.bfloat16):
    k1, k2, k3 = jax.random.split(key, 3)
    std = 0.1
    head_dim = dim // num_heads
    scale = float(head_dim) ** -0.5              # qk_scale=None -> head_dim**-0.5
    w_qkv = jax.random.normal(k1, (3 * dim, dim), jnp.float32) * std
    w_proj = jax.random.normal(k2, (dim, dim), jnp.float32) * std
    # Pre-transpose ONCE to (in, out) and fold the softmax scale into the
    # q-output columns (mathematically identical to scaling q / the scores).
    w_qkv_t = w_qkv.T.at[:, :dim].multiply(scale)
    return {
        "w_qkv_t": w_qkv_t.astype(dtype),
        "b_qkv": jnp.zeros((3 * dim,), jnp.float32),     # qkv_bias=False
        "w_proj_t": w_proj.T.astype(dtype),
        "b_proj": jax.random.normal(k3, (dim,), jnp.float32) * std,
    }


def _reference(x, params, num_heads):
    """Plain-JAX mirror of the module math with the same precision choices
    (bf16 MXU operands, f32 accumulation, scale folded into w_qkv_t)."""
    B, N, C = x.shape
    H = num_heads
    D = C // H
    cdt = params["w_qkv_t"].dtype
    x2d = x.reshape(B * N, C).astype(cdt)
    qkv = (jnp.dot(x2d, params["w_qkv_t"], preferred_element_type=jnp.float32)
           + params["b_qkv"]).astype(cdt)
    qkv = qkv.reshape(B, N, 3, H, D).transpose(2, 0, 3, 1, 4)     # (3, B, H, N, D)
    q, k, v = qkv[0], qkv[1], qkv[2]          # scale already folded into q via W
    s = jnp.einsum("bhnd,bhmd->bhnm", q, k, preferred_element_type=jnp.float32)
    p = jax.nn.softmax(s, axis=-1).astype(cdt)
    out = jnp.einsum("bhnm,bhmd->bhnd", p, v, preferred_element_type=jnp.float32)
    out = out.transpose(0, 2, 1, 3).reshape(B * N, C).astype(cdt)
    out = (jnp.dot(out, params["w_proj_t"], preferred_element_type=jnp.float32)
           + params["b_proj"])
    return out.reshape(B, N, C).astype(jnp.float32)


if __name__ == "__main__":
    # Small but lane-dense demo shapes (C, 3C, C/2 multiples of 128) so the
    # unmasked-store / resident-weight paths the kernel targets are exercised.
    B, N, C = 2, 64, 256
    num_heads = 8               # head_dim = 32

    key = jax.random.PRNGKey(0)
    kx, kp = jax.random.split(key)
    x = jax.random.normal(kx, (B, N, C), jnp.float32)
    params = init_params(kp, C, num_heads)

    out = attention_forward(x, params, num_heads)
    out = jax.block_until_ready(out)

    ref = _reference(x, params, num_heads)
    assert out.shape == (B, N, C)
    max_err = float(jnp.max(jnp.abs(out - ref)))
    assert jnp.allclose(out, ref, atol=3e-2, rtol=3e-2), (
        f"mismatch vs reference: {max_err}")

    print("KERNEL_OK")
</pallas_src>

<mosaic_0001>
module attributes {stable_mosaic.version = 11 : i64} {
  func.func @_linear_kernel(%arg0: i32, %arg1: memref<128x256xf32, #tpu.memory_space<vmem>>, %arg2: memref<256x768xbf16, #tpu.memory_space<vmem>>, %arg3: memref<1x768xf32, #tpu.memory_space<vmem>>, %arg4: memref<128x768xbf16, #tpu.memory_space<vmem>>) attributes {dimension_semantics = [#tpu.dimension_semantics<parallel>], iteration_bounds = array<i64: 1>, scalar_prefetch = 0 : i64, scratch_operands = 0 : i64, tpu.core_type = #tpu.core_type<tc>, window_params = [{transform_indices = @transform_0, window_bounds = array<i64: 128, 256>}, {pipeline_mode = #tpu.pipeline_mode<synchronous>, transform_indices = @transform_1, window_bounds = array<i64: 256, 768>}, {pipeline_mode = #tpu.pipeline_mode<synchronous>, transform_indices = @transform_2, window_bounds = array<i64: 1, 768>}, {transform_indices = @transform_3, window_bounds = array<i64: 128, 768>}]} {
    %c0 = arith.constant 0 : index
    %c0_0 = arith.constant 0 : index
    %0 = vector.load %arg1[%c0, %c0_0] : memref<128x256xf32, #tpu.memory_space<vmem>>, vector<128x256xf32>
    %1 = arith.truncf %0 : vector<128x256xf32> to vector<128x256xbf16>
    %c0_1 = arith.constant 0 : index
    %c0_2 = arith.constant 0 : index
    %2 = vector.load %arg2[%c0_1, %c0_2] : memref<256x768xbf16, #tpu.memory_space<vmem>>, vector<256x768xbf16>
    %cst = arith.constant dense<0.000000e+00> : vector<128x768xf32>
    %3 = tpu.matmul %1, %2, %cst {dimension_numbers = #tpu.dot_dimension_numbers<[1], [0], [0], [1], [0, 0, 1, 1], [], []>} : vector<128x256xbf16>, vector<256x768xbf16>, vector<128x768xf32> -> vector<128x768xf32>
    %c0_3 = arith.constant 0 : index
    %c0_4 = arith.constant 0 : index
    %4 = vector.load %arg3[%c0_3, %c0_4] : memref<1x768xf32, #tpu.memory_space<vmem>>, vector<1x768xf32>
    %5 = vector.broadcast %4 : vector<1x768xf32> to vector<128x768xf32>
    %6 = arith.addf %3, %5 : vector<128x768xf32>
    %7 = arith.truncf %6 : vector<128x768xf32> to vector<128x768xbf16>
    %c0_5 = arith.constant 0 : index
    %c0_6 = arith.constant 0 : index
    %8 = vector.load %arg4[%c0_5, %c0_6] : memref<128x768xbf16, #tpu.memory_space<vmem>>, vector<128x768xbf16>
    tpu.vector_store %arg4[%c0_5, %c0_6], %7 {strides = array<i32>} : memref<128x768xbf16, #tpu.memory_space<vmem>>, vector<128x768xbf16>,
    return
  }
  func.func @transform_0(%arg0: i32) -> (i32, i32) {
    %c0_i32 = arith.constant 0 : i32
    %c0_i32_0 = arith.constant 0 : i32
    return %arg0, %c0_i32 : i32, i32
  }
  func.func @transform_1(%arg0: i32) -> (i32, i32) {
    %c0_i32 = arith.constant 0 : i32
    %c0_i32_0 = arith.constant 0 : i32
    %c0_i32_1 = arith.constant 0 : i32
    return %c0_i32, %c0_i32_0 : i32, i32
  }
  func.func @transform_2(%arg0: i32) -> (i32, i32) {
    %c0_i32 = arith.constant 0 : i32
    %c0_i32_0 = arith.constant 0 : i32
    %c0_i32_1 = arith.constant 0 : i32
    return %c0_i32, %c0_i32_0 : i32, i32
  }
  func.func @transform_3(%arg0: i32) -> (i32, i32) {
    %c0_i32 = arith.constant 0 : i32
    %c0_i32_0 = arith.constant 0 : i32
    return %arg0, %c0_i32 : i32, i32
  }
}

</mosaic_0001>

<bundles_post_ra>
// kernel: tpu_custom_call.1
= control target key start
LH: loop header
LB: loop body
LE: loop exit
PB: predicated region body
PF: predicated region fallthrough
CT: control target
= control target key end

     0   :  { %8 = vsyncpa [#allocation3], 0  ;;  %s2282_s0 = inlined_call_operand.hbm [shape: f32[128,256], index: 0, kind: input, shape index: {}]   ;;  %s2283_s1 = inlined_call_operand.hbm [shape: bf16[256,768], index: 1, kind: input, shape index: {}]   ;;  %s2284_s2 = inlined_call_operand.hbm [shape: f32[1,768], index: 2, kind: input, shape index: {}]   ;;  %s2285_s3 = inlined_call_operand.hbm [shape: bf16[128,768], index: 3, kind: output, shape index: {}]  }
   0x1   :  { %9 = vsyncpa [#allocation6], 0  ;;  %s28_s14 = sshll.u32 %s2283_s1, 4  ;;  %s29_s14 = int_to_ptr.hbm [resolvable:$true] %s28_s14 }
   0x2   :  { %10 = vsyncpa [#allocation4], 0  ;;  %s1992_s15 = smov [#allocation5]   ;;  %s15_s19 = sshll.u32 %s2282_s0, 4  ;;  %s16_s19 = int_to_ptr.hbm [resolvable:$true] %s15_s19 }
   0x3   :  { %s30_s16 = sshll.u32 %s1992_s15, 4  ;;  %s1993_s20 = smov 384   ;;  %s31_s16 = int_to_ptr.vmem [resolvable:$true] %s30_s16 }
   0x4   :  { %s1994_s21 = smov 24   ;;  %s1995_s22 = smov [#allocation2]  }
   0x5   :  { %36 = dma.hbm_to_vmem [thread:$0]  %s29_s14, 12288, %s31_s16, [#allocation6], %s1993_s20, %s1993_s20, %s1994_s21  }
   0x6   :  { %s17_s23 = sshll.u32 %s1995_s22, 4  ;;  %s1996_s1 = smov 256   ;;  %s18_s23 = int_to_ptr.vmem [resolvable:$true] %s17_s23 }
   0x7   :  { %s1997_s24 = smov 16   ;;  %s42_s27 = sshll.u32 %s2284_s2, 4  ;;  %s43_s27 = int_to_ptr.hbm [resolvable:$true] %s42_s27 }
   0x8   :  { %23 = dma.hbm_to_vmem [thread:$0]  %s16_s19, 4096, %s18_s23, [#allocation3], %s1996_s1, %s1996_s1, %s1997_s24  }
   0x9   :  { %s1998_s28 = smov [#allocation7]  }
   0xa   :  { %s44_s0 = sshll.u32 %s1998_s28, 4  ;;  %s45_s0 = int_to_ptr.vmem [resolvable:$true] %s44_s0 }
   0xb   :  { %47 = dma.hbm_to_vmem [thread:$0]  %s43_s27, 96, %s45_s0, [#allocation6]  }
   0xc   :  { %1986 = dma.done.wait [#allocation3], 4096  }
   0xd   :  { %1987 = vsyncadd [#allocation3], 4294963200 }
   0xe   :  { %1988 = dma.done.wait [#allocation6], 12384  }
   0xf   :  { %1989 = vsyncadd [#allocation6], 4294954912  ;;  %v1572_v0 = vld [vmem:[#allocation5 + $0x150] sm:$0xf]  ;;  %v1831_v1 = vld [vmem:[#allocation5 + $0x164] sm:$0xf0] }
  0x10   :  { %v1764_v2 = vld [vmem:[#allocation5 + $0x2d0] sm:$0xf]  ;;  %v1573_v3 = vor.u32 %v1831_v1, %v1572_v0  ;;  %v1879_v4 = vld [vmem:[#allocation5 + $0x2e4] sm:$0xf0]  ;;  %v1828_v5 = vld [vmem:[#allocation5 + $0x154] sm:$0xf] }
  0x11   :  { %v1574_v6 = vld [vmem:[#allocation5 + $0x168] sm:$0xf0]  ;;  %v1765_v7 = vor.u32 %v1879_v4, %v1764_v2  ;;  %v1876_v9 = vld [vmem:[#allocation5 + $0x2d4] sm:$0xf]  ;;  %v1548_v11 = vld [vmem:[#allocation5 + $0x120] sm:$0xf] }
  0x12   :  { %v1577_v8 = vor.u32 %v1828_v5, %v1574_v6  ;;  %v1766_v10 = vld [vmem:[#allocation5 + $0x2e8] sm:$0xf0]  ;;  %698 = vmatpush.bf16.msra.mxu0 %v1573_v3  ;;  %v1825_v13 = vld [vmem:[#allocation5 + $0x134] sm:$0xf0]  ;;  %v1740_v14 = vld [vmem:[#allocation5 + $0x2a0] sm:$0xf] }
  0x13   :  { %v1769_v12 = vor.u32 %v1876_v9, %v1766_v10  ;;  %v1873_v15 = vld [vmem:[#allocation5 + $0x2b4] sm:$0xf0]  ;;  %747 = vmatpush.bf16.msra.mxu1 %v1765_v7  ;;  %v1549_v16 = vor.u32 %v1825_v13, %v1548_v11  ;;  %v1822_v18 = vld [vmem:[#allocation5 + $0x124] sm:$0xf]  ;;  %v1550_v19 = vld [vmem:[#allocation5 + $0x138] sm:$0xf0] }
  0x14   :  { %796 = vmatpush.bf16.msra.mxu2 %v1577_v8  ;;  %v1741_v17 = vor.u32 %v1873_v15, %v1740_v14  ;;  %v1870_v20 = vld [vmem:[#allocation5 + $0x2a4] sm:$0xf]  ;;  %v1553_v21 = vor.u32 %v1822_v18, %v1550_v19  ;;  %v1742_v22 = vld [vmem:[#allocation5 + $0x2b8] sm:$0xf0]  ;;  %v1524_v23 = vld [vmem:[#allocation5 + $0xf0] sm:$0xf] }
  0x15   :  { %845 = vmatpush.bf16.msra.mxu3 %v1769_v12  ;;  %v1819_v24 = vld [vmem:[#allocation5 + $0x104] sm:$0xf0]  ;;  %v1745_v25 = vor.u32 %v1870_v20, %v1742_v22  ;;  %v1716_v26 = vld [vmem:[#allocation5 + $0x270] sm:$0xf]  ;;  %v1816_v28 = vld [vmem:[#allocation5 + $0xf4] sm:$0xf] }
  0x16   :  { %v1867_v27 = vld [vmem:[#allocation5 + $0x284] sm:$0xf0]  ;;  %699 = vmatpush.bf16.msra.mxu0 %v1549_v16  ;;  %v1525_v29 = vor.u32 %v1819_v24, %v1524_v23  ;;  %v1526_v30 = vld [vmem:[#allocation5 + $0x108] sm:$0xf0]  ;;  %v1864_v31 = vld [vmem:[#allocation5 + $0x274] sm:$0xf] }
  0x17   :  { %v1718_v32 = vld [vmem:[#allocation5 + $0x288] sm:$0xf0]  ;;  %748 = vmatpush.bf16.msra.mxu1 %v1741_v17  ;;  %v1717_v33 = vor.u32 %v1867_v27, %v1716_v26  ;;  %v1529_v34 = vor.u32 %v1816_v28, %v1526_v30  ;;  %v1500_v35 = vld [vmem:[#allocation5 + $0xc0] sm:$0xf]  ;;  %v1813_v36 = vld [vmem:[#allocation5 + $0xd4] sm:$0xf0] }
  0x18   :  { %797 = vmatpush.bf16.msra.mxu2 %v1553_v21  ;;  %v1692_v37 = vld [vmem:[#allocation5 + $0x240] sm:$0xf]  ;;  %v1721_v38 = vor.u32 %v1864_v31, %v1718_v32  ;;  %v1861_v39 = vld [vmem:[#allocation5 + $0x254] sm:$0xf0]  ;;  %v1810_v40 = vld [vmem:[#allocation5 + $0xc4] sm:$0xf]  ;;  %v1501_v44 = vor.u32 %v1813_v36, %v1500_v35 }
  0x19   :  { %846 = vmatpush.bf16.msra.mxu3 %v1745_v25  ;;  %v1502_v41 = vld [vmem:[#allocation5 + $0xd8] sm:$0xf0]  ;;  %v1858_v42 = vld [vmem:[#allocation5 + $0x244] sm:$0xf]  ;;  %v1693_v45 = vor.u32 %v1861_v39, %v1692_v37  ;;  %v1476_v47 = vld [vmem:[#allocation5 + $0x90] sm:$0xf] }
  0x1a   :  { %v1694_v43 = vld [vmem:[#allocation5 + $0x258] sm:$0xf0]  ;;  %700 = vmatpush.bf16.msra.mxu0 %v1525_v29  ;;  %v1505_v46 = vor.u32 %v1810_v40, %v1502_v41  ;;  %v1807_v48 = vld [vmem:[#allocation5 + $0xa4] sm:$0xf0]  ;;  %v1668_v49 = vld [vmem:[#allocation5 + $0x210] sm:$0xf] }
  0x1b   :  { %749 = vmatpush.bf16.msra.mxu1 %v1717_v33  ;;  %v1697_v50 = vor.u32 %v1858_v42, %v1694_v43  ;;  %v1855_v51 = vld [vmem:[#allocation5 + $0x224] sm:$0xf0]  ;;  %v1804_v52 = vld [vmem:[#allocation5 + $0x94] sm:$0xf]  ;;  %v1478_v53 = vld [vmem:[#allocation5 + $0xa8] sm:$0xf0]  ;;  %v1477_v56 = vor.u32 %v1807_v48, %v1476_v47 }
  0x1c   :  { %798 = vmatpush.bf16.msra.mxu2 %v1529_v34  ;;  %v1852_v54 = vld [vmem:[#allocation5 + $0x214] sm:$0xf]  ;;  %v1670_v55 = vld [vmem:[#allocation5 + $0x228] sm:$0xf0]  ;;  %v1669_v57 = vor.u32 %v1855_v51, %v1668_v49  ;;  %v1481_v58 = vor.u32 %v1804_v52, %v1478_v53  ;;  %v1452_v59 = vld [vmem:[#allocation5 + $0x60] sm:$0xf] }
  0x1d   :  { %847 = vmatpush.bf16.msra.mxu3 %v1721_v38  ;;  %v1801_v60 = vld [vmem:[#allocation5 + $0x74] sm:$0xf0]  ;;  %v1644_v61 = vld [vmem:[#allocation5 + $0x1e0] sm:$0xf]  ;;  %v1673_v62 = vor.u32 %v1852_v54, %v1670_v55  ;;  %v1798_v0 = vld [vmem:[#allocation5 + $0x64] sm:$0xf] }
  0x1e   :  { %701 = vmatpush.bf16.msra.mxu0 %v1501_v44  ;;  %v1849_v63 = vld [vmem:[#allocation5 + $0x1f4] sm:$0xf0]  ;;  %v1454_v1 = vld [vmem:[#allocation5 + $0x78] sm:$0xf0]  ;;  %v1846_v2 = vld [vmem:[#allocation5 + $0x1e4] sm:$0xf]  ;;  %v1453_v4 = vor.u32 %v1801_v60, %v1452_v59 }
  0x1f   :  { %750 = vmatpush.bf16.msra.mxu1 %v1693_v45  ;;  %v1646_v3 = vld [vmem:[#allocation5 + $0x1f8] sm:$0xf0]  ;;  %v1645_v5 = vor.u32 %v1849_v63, %v1644_v61  ;;  %v1457_v6 = vor.u32 %v1798_v0, %v1454_v1  ;;  %v1428_v7 = vld [vmem:[#allocation5 + $0x30] sm:$0xf]  ;;  %v1795_v8 = vld [vmem:[#allocation5 + $0x44] sm:$0xf0] }
  0x20   :  { %799 = vmatpush.bf16.msra.mxu2 %v1505_v46  ;;  %v1620_v9 = vld [vmem:[#allocation5 + $0x1b0] sm:$0xf]  ;;  %v1649_v10 = vor.u32 %v1846_v2, %v1646_v3  ;;  %v1843_v11 = vld [vmem:[#allocation5 + $0x1c4] sm:$0xf0]  ;;  %v1792_v12 = vld [vmem:[#allocation5 + $0x34] sm:$0xf]  ;;  %v1429_v16 = vor.u32 %v1795_v8, %v1428_v7 }
  0x21   :  { %848 = vmatpush.bf16.msra.mxu3 %v1697_v50  ;;  %v1430_v13 = vld [vmem:[#allocation5 + $0x48] sm:$0xf0]  ;;  %v1840_v14 = vld [vmem:[#allocation5 + $0x1b4] sm:$0xf]  ;;  %v1404_v17 = vld [vmem:[#allocation5] sm:$0xf]  ;;  %v1621_v19 = vor.u32 %v1843_v11, %v1620_v9 }
  0x22   :  { %702 = vmatpush.bf16.msra.mxu0 %v1477_v56  ;;  %v1622_v15 = vld [vmem:[#allocation5 + $0x1c8] sm:$0xf0]  ;;  %v1789_v18 = vld [vmem:[#allocation5 + $0x14] sm:$0xf0]  ;;  %v1433_v20 = vor.u32 %v1792_v12, %v1430_v13  ;;  %v1596_v21 = vld [vmem:[#allocation5 + $0x180] sm:$0xf] }
  0x23   :  { %751 = vmatpush.bf16.msra.mxu1 %v1669_v57  ;;  %v1837_v22 = vld [vmem:[#allocation5 + $0x194] sm:$0xf0]  ;;  %v1786_v23 = vld [vmem:[#allocation5 + $0x4] sm:$0xf]  ;;  %v1625_v24 = vor.u32 %v1840_v14, %v1622_v15  ;;  %v1406_v25 = vld [vmem:[#allocation5 + $0x18] sm:$0xf0]  ;;  %v1405_v31 = vor.u32 %v1789_v18, %v1404_v17 }
  0x24   :  { %800 = vmatpush.bf16.msra.mxu2 %v1481_v58  ;;  %v1834_v26 = vld [vmem:[#allocation5 + $0x184] sm:$0xf]  ;;  %v1598_v27 = vld [vmem:[#allocation5 + $0x198] sm:$0xf0]  ;;  %v1582_v30 = vld [vmem:[#allocation5 + $0x170] sm:$0xf0]  ;;  %v1597_v35 = vor.u32 %v1837_v22, %v1596_v21  ;;  %v1409_v36 = vor.u32 %v1786_v23, %v1406_v25 }
  0x25   :  { %849 = vmatpush.bf16.msra.mxu3 %v1673_v62  ;;  %v60_v28 = vld [vmem:[#allocation2] sm:$0xff]  ;;  %v1829_v29 = vld [vmem:[#allocation5 + $0x15c] sm:$0xf]  ;;  %v62_v32 = vld [vmem:[#allocation2 + $0x10] sm:$0xff]  ;;  %v1601_v39 = vor.u32 %v1834_v26, %v1598_v27  ;;  %s1999_s2 = smov [#allocation8]   ;;  %s1388_s5 = sshll.u32 %s2285_s3, 4  ;;  %s1389_s5 = int_to_ptr.hbm [resolvable:$true] %s1388_s5 }
  0x26   :  { %703 = vmatpush.bf16.msra.mxu0 %v1453_v4  ;;  %v1877_v33 = vld [vmem:[#allocation5 + $0x2dc] sm:$0xf]  ;;  %v1774_v34 = vld [vmem:[#allocation5 + $0x2f0] sm:$0xf0]  ;;  %v61_v37 = vld [vmem:[#allocation2 + $0x8] sm:$0xff]  ;;  %v1585_v40 = vor.u32 %v1829_v29, %v1582_v30  ;;  %v2032_v44 = vpack.c.bf16 %v62_v32, %v60_v28  ;;  %s1386_s29 = sshll.u32 %s1999_s2, 4  ;;  %s1387_s29 = int_to_ptr.vmem [resolvable:$true] %s1386_s29 }
  0x27   :  { %752 = vmatpush.bf16.msra.mxu1 %v1645_v5  ;;  %v63_v38 = vld [vmem:[#allocation2 + $0x18] sm:$0xff]  ;;  %v1832_v42 = vld [vmem:[#allocation5 + $0x16c] sm:$0xf0]  ;;  %v1777_v45 = vor.u32 %v1877_v33, %v1774_v34  ;;  %v1823_v47 = vld [vmem:[#allocation5 + $0x12c] sm:$0xf] }
  0x28   :  { %801 = vmatpush.bf16.msra.mxu2 %v1457_v6  ;;  %v1580_v41 = vld [vmem:[#allocation5 + $0x158] sm:$0xf]  ;;  %v1880_v46 = vld [vmem:[#allocation5 + $0x2ec] sm:$0xf0]  ;;  %v1558_v48 = vld [vmem:[#allocation5 + $0x140] sm:$0xf0]  ;;  %v2034_v49 = vpack.c.bf16 %v63_v38, %v61_v37 }
  0x29   :  { %850 = vmatpush.bf16.msra.mxu3 %v1649_v10  ;;  %v1772_v43 = vld [vmem:[#allocation5 + $0x2d8] sm:$0xf]  ;;  %v1871_v50 = vld [vmem:[#allocation5 + $0x2ac] sm:$0xf]  ;;  %v1750_v51 = vld [vmem:[#allocation5 + $0x2c0] sm:$0xf0]  ;;  %v1581_v52 = vor.u32 %v1832_v42, %v1580_v41  ;;  %v1561_v54 = vor.u32 %v1823_v47, %v1558_v48 }
  0x2a   :  { %704 = vmatpush.bf16.msra.mxu0 %v1429_v16  ;;  %v1773_v53 = vor.u32 %v1880_v46, %v1772_v43  ;;  %v1556_v55 = vld [vmem:[#allocation5 + $0x128] sm:$0xf]  ;;  %v1826_v56 = vld [vmem:[#allocation5 + $0x13c] sm:$0xf0]  ;;  %v1753_v57 = vor.u32 %v1871_v50, %v1750_v51  ;;  %v1817_v61 = vld [vmem:[#allocation5 + $0xfc] sm:$0xf] }
  0x2b   :  { %753 = vmatpush.bf16.msra.mxu1 %v1621_v19  ;;  %v1748_v58 = vld [vmem:[#allocation5 + $0x2a8] sm:$0xf]  ;;  %v1874_v59 = vld [vmem:[#allocation5 + $0x2bc] sm:$0xf0]  ;;  %v1557_v60 = vor.u32 %v1826_v56, %v1556_v55  ;;  %v1534_v62 = vld [vmem:[#allocation5 + $0x110] sm:$0xf0] }
  0x2c   :  { %802 = vmatpush.bf16.msra.mxu2 %v1433_v20  ;;  %v1865_v63 = vld [vmem:[#allocation5 + $0x27c] sm:$0xf]  ;;  %v1749_v0 = vor.u32 %v1874_v59, %v1748_v58  ;;  %v1537_v1 = vor.u32 %v1817_v61, %v1534_v62  ;;  %v1726_v2 = vld [vmem:[#allocation5 + $0x290] sm:$0xf0]  ;;  %v1532_v3 = vld [vmem:[#allocation5 + $0xf8] sm:$0xf] }
  0x2d   :  { %851 = vmatpush.bf16.msra.mxu3 %v1625_v24  ;;  %v1820_v4 = vld [vmem:[#allocation5 + $0x10c] sm:$0xf0]  ;;  %v1729_v5 = vor.u32 %v1865_v63, %v1726_v2  ;;  %v1724_v6 = vld [vmem:[#allocation5 + $0x278] sm:$0xf]  ;;  %v64_v10 = vld [vmem:[#allocation2 + $0x20] sm:$0xff] }
  0x2e   :  { %705 = vmatpush.bf16.msra.mxu0 %v1405_v31  ;;  %v1868_v7 = vld [vmem:[#allocation5 + $0x28c] sm:$0xf0]  ;;  %v1533_v8 = vor.u32 %v1820_v4, %v1532_v3  ;;  %v65_v12 = vld [vmem:[#allocation2 + $0x28] sm:$0xff]  ;;  %v67_v13 = vld [vmem:[#allocation2 + $0x38] sm:$0xff] }
  0x2f   :  { %754 = vmatpush.bf16.msra.mxu1 %v1597_v35  ;;  %v1725_v9 = vor.u32 %v1868_v7, %v1724_v6  ;;  %v66_v11 = vld [vmem:[#allocation2 + $0x30] sm:$0xff]  ;;  %v2042_v15 = vpack.c.bf16 %v67_v13, %v65_v12  ;;  %v1811_v16 = vld [vmem:[#allocation5 + $0xcc] sm:$0xf]  ;;  %v1510_v17 = vld [vmem:[#allocation5 + $0xe0] sm:$0xf0] }
  0x30   :  { %803 = vmatpush.bf16.msra.mxu2 %v1409_v36  ;;  %v2040_v14 = vpack.c.bf16 %v66_v11, %v64_v10  ;;  %v1859_v18 = vld [vmem:[#allocation5 + $0x24c] sm:$0xf]  ;;  %v1513_v19 = vor.u32 %v1811_v16, %v1510_v17  ;;  %v1702_v20 = vld [vmem:[#allocation5 + $0x260] sm:$0xf0]  ;;  %v1508_v21 = vld [vmem:[#allocation5 + $0xc8] sm:$0xf] }
  0x31   :  { %852 = vmatpush.bf16.msra.mxu3 %v1601_v39  ;;  %706 = vmatmul.bf16.vlgmr.msra.gmra.mxu0 %v2032_v44  ;;  %v1814_v22 = vld [vmem:[#allocation5 + $0xdc] sm:$0xf0]  ;;  %v1705_v23 = vor.u32 %v1859_v18, %v1702_v20  ;;  %v1700_v25 = vld [vmem:[#allocation5 + $0x248] sm:$0xf]  ;;  %v70_v29 = vld [vmem:[#allocation2 + $0x50] sm:$0xff] }
  0x32   :  { %755 = vmatmul.bf16.vlgmr.msra.gmra.mxu1 %v2034_v49  ;;  %894 = vmatpush.bf16.msrb.mxu0 %v1581_v52  ;;  %v1509_v24 = vor.u32 %v1814_v22, %v1508_v21  ;;  %v1862_v26 = vld [vmem:[#allocation5 + $0x25c] sm:$0xf0]  ;;  %v69_v30 = vld [vmem:[#allocation2 + $0x48] sm:$0xff]  ;;  %v71_v31 = vld [vmem:[#allocation2 + $0x58] sm:$0xff] }
  0x33   :  { %804 = vmatmul.bf16.vlgmr.msra.gmra.mxu2 %v2032_v44  ;;  %943 = vmatpush.bf16.msrb.mxu1 %v1773_v53  ;;  %v1701_v27 = vor.u32 %v1862_v26, %v1700_v25  ;;  %v68_v28 = vld [vmem:[#allocation2 + $0x40] sm:$0xff]  ;;  %v2050_v33 = vpack.c.bf16 %v71_v31, %v69_v30  ;;  %v1805_v34 = vld [vmem:[#allocation5 + $0x9c] sm:$0xf]  ;;  %v1486_v35 = vld [vmem:[#allocation5 + $0xb0] sm:$0xf0] }
  0x34   :  { %992 = vmatpush.bf16.msrb.mxu2 %v1585_v40  ;;  %853 = vmatmul.bf16.vlgmr.msra.gmra.mxu3 %v2034_v49  ;;  %v2048_v32 = vpack.c.bf16 %v70_v29, %v68_v28  ;;  %v1853_v36 = vld [vmem:[#allocation5 + $0x21c] sm:$0xf]  ;;  %v1489_v37 = vor.u32 %v1805_v34, %v1486_v35  ;;  %v1678_v38 = vld [vmem:[#allocation5 + $0x230] sm:$0xf0]  ;;  %v1484_v39 = vld [vmem:[#allocation5 + $0x98] sm:$0xf] }
  0x35   :  { %1041 = vmatpush.bf16.msrb.mxu3 %v1777_v45  ;;  %v1808_v40 = vld [vmem:[#allocation5 + $0xac] sm:$0xf0]  ;;  %v1681_v41 = vor.u32 %v1853_v36, %v1678_v38  ;;  %v1676_v43 = vld [vmem:[#allocation5 + $0x218] sm:$0xf]  ;;  %v72_v47 = vld [vmem:[#allocation2 + $0x60] sm:$0xff] }
  0x36   :  { %895 = vmatpush.bf16.msrb.mxu0 %v1557_v60  ;;  %v1485_v42 = vor.u32 %v1808_v40, %v1484_v39  ;;  %v1856_v45 = vld [vmem:[#allocation5 + $0x22c] sm:$0xf0]  ;;  %v73_v50 = vld [vmem:[#allocation2 + $0x68] sm:$0xff]  ;;  %v75_v51 = vld [vmem:[#allocation2 + $0x78] sm:$0xff] }
  0x37   :  { %944 = vmatpush.bf16.msrb.mxu1 %v1749_v0  ;;  %v1677_v46 = vor.u32 %v1856_v45, %v1676_v43  ;;  %v74_v48 = vld [vmem:[#allocation2 + $0x70] sm:$0xff]  ;;  %v2058_v53 = vpack.c.bf16 %v75_v51, %v73_v50  ;;  %v1462_v55 = vld [vmem:[#allocation5 + $0x80] sm:$0xf0]  ;;  %v1847_v56 = vld [vmem:[#allocation5 + $0x1ec] sm:$0xf] }
  0x38   :  { %993 = vmatpush.bf16.msrb.mxu2 %v1561_v54  ;;  %v2056_v52 = vpack.c.bf16 %v74_v48, %v72_v47  ;;  %v1799_v54 = vld [vmem:[#allocation5 + $0x6c] sm:$0xf]  ;;  %v1654_v58 = vld [vmem:[#allocation5 + $0x200] sm:$0xf0]  ;;  %v1460_v59 = vld [vmem:[#allocation5 + $0x68] sm:$0xf] }
  0x39   :  { %1042 = vmatpush.bf16.msrb.mxu3 %v1753_v57  ;;  %v1465_v57 = vor.u32 %v1799_v54, %v1462_v55  ;;  %v1802_v60 = vld [vmem:[#allocation5 + $0x7c] sm:$0xf0]  ;;  %v1657_v61 = vor.u32 %v1847_v56, %v1654_v58  ;;  %v1652_v63 = vld [vmem:[#allocation5 + $0x1e8] sm:$0xf]  ;;  %v78_v3 = vld [vmem:[#allocation2 + $0x90] sm:$0xff] }
  0x3a   :  { %896 = vmatpush.bf16.msrb.mxu0 %v1533_v8  ;;  %v1461_v62 = vor.u32 %v1802_v60, %v1460_v59  ;;  %v1850_v0 = vld [vmem:[#allocation5 + $0x1fc] sm:$0xf0]  ;;  %v77_v4 = vld [vmem:[#allocation2 + $0x88] sm:$0xff]  ;;  %v1793_v8 = vld [vmem:[#allocation5 + $0x3c] sm:$0xf] }
  0x3b   :  { %945 = vmatpush.bf16.msrb.mxu1 %v1725_v9  ;;  %v76_v2 = vld [vmem:[#allocation2 + $0x80] sm:$0xff]  ;;  %v1438_v9 = vld [vmem:[#allocation5 + $0x50] sm:$0xf0]  ;;  %v1841_v10 = vld [vmem:[#allocation5 + $0x1bc] sm:$0xf] }
  0x3c   :  { %994 = vmatpush.bf16.msrb.mxu2 %v1537_v1  ;;  %v1653_v1 = vor.u32 %v1850_v0, %v1652_v63  ;;  %v2064_v6 = vpack.c.bf16 %v78_v3, %v76_v2  ;;  %v1441_v11 = vor.u32 %v1793_v8, %v1438_v9  ;;  %v1630_v12 = vld [vmem:[#allocation5 + $0x1d0] sm:$0xf0]  ;;  %v1436_v13 = vld [vmem:[#allocation5 + $0x38] sm:$0xf]  ;;  %v1796_v16 = vld [vmem:[#allocation5 + $0x4c] sm:$0xf0] }
  0x3d   :  { %1043 = vmatpush.bf16.msrb.mxu3 %v1729_v5  ;;  %v79_v5 = vld [vmem:[#allocation2 + $0x98] sm:$0xff]  ;;  %v1633_v17 = vor.u32 %v1841_v10, %v1630_v12  ;;  %v1437_v18 = vor.u32 %v1796_v16, %v1436_v13  ;;  %v1844_v20 = vld [vmem:[#allocation5 + $0x1cc] sm:$0xf0]  ;;  %v80_v22 = vld [vmem:[#allocation2 + $0xa0] sm:$0xff] }
  0x3e   :  { %897 = vmatpush.bf16.msrb.mxu0 %v1509_v24  ;;  %v2066_v7 = vpack.c.bf16 %v79_v5, %v77_v4  ;;  %v81_v24 = vld [vmem:[#allocation2 + $0xa8] sm:$0xff]  ;;  %v83_v25 = vld [vmem:[#allocation2 + $0xb8] sm:$0xff]  ;;  %v1414_v29 = vld [vmem:[#allocation5 + $0x20] sm:$0xf0] }
  0x3f   :  { %946 = vmatpush.bf16.msrb.mxu1 %v1701_v27  ;;  %v2074_v27 = vpack.c.bf16 %v83_v25, %v81_v24  ;;  %v1787_v28 = vld [vmem:[#allocation5 + $0xc] sm:$0xf]  ;;  %v1606_v34 = vld [vmem:[#allocation5 + $0x1a0] sm:$0xf0]  ;;  %v1412_v35 = vld [vmem:[#allocation5 + $0x8] sm:$0xf] }
  0x40   :  { %995 = vmatpush.bf16.msrb.mxu2 %v1513_v19  ;;  %v1628_v19 = vld [vmem:[#allocation5 + $0x1b8] sm:$0xf]  ;;  %v1835_v30 = vld [vmem:[#allocation5 + $0x18c] sm:$0xf]  ;;  %v1417_v31 = vor.u32 %v1787_v28, %v1414_v29  ;;  %v1790_v36 = vld [vmem:[#allocation5 + $0x1c] sm:$0xf0] }
  0x41   :  { %711 = vmatmul.bf16.gmra.mxu0 %v2040_v14  ;;  %1044 = vmatpush.bf16.msrb.mxu3 %v1705_v23  ;;  %v1629_v21 = vor.u32 %v1844_v20, %v1628_v19  ;;  %v82_v23 = vld [vmem:[#allocation2 + $0xb0] sm:$0xff]  ;;  %v1413_v38 = vor.u32 %v1790_v36, %v1412_v35  ;;  %v1604_v39 = vld [vmem:[#allocation5 + $0x188] sm:$0xf]  ;;  %v1838_v40 = vld [vmem:[#allocation5 + $0x19c] sm:$0xf0] }
  0x42   :  { %760 = vmatmul.bf16.gmra.mxu1 %v2042_v15  ;;  %898 = vmatpush.bf16.msrb.mxu0 %v1485_v42  ;;  %v2072_v26 = vpack.c.bf16 %v82_v23, %v80_v22  ;;  %v84_v42 = vld [vmem:[#allocation2 + $0xc0] sm:$0xff]  ;;  %v86_v43 = vld [vmem:[#allocation2 + $0xd0] sm:$0xff]  ;;  %v85_v45 = vld [vmem:[#allocation2 + $0xc8] sm:$0xff] }
  0x43   :  { %809 = vmatmul.bf16.gmra.mxu2 %v2040_v14  ;;  %947 = vmatpush.bf16.msrb.mxu1 %v1677_v46  ;;  %v87_v46 = vld [vmem:[#allocation2 + $0xd8] sm:$0xff]  ;;  %v2080_v47 = vpack.c.bf16 %v86_v43, %v84_v42  ;;  %v1830_v50 = vld [vmem:[#allocation5 + $0x164] sm:$0xf]  ;;  %v90_v59 = vld [vmem:[#allocation2 + $0xf0] sm:$0xff] }
  0x44   :  { %858 = vmatmul.bf16.gmra.mxu3 %v2042_v15  ;;  %996 = vmatpush.bf16.msrb.mxu2 %v1489_v37  ;;  %v1609_v37 = vor.u32 %v1835_v30, %v1606_v34  ;;  %v2082_v48 = vpack.c.bf16 %v87_v46, %v85_v45  ;;  %v1590_v51 = vld [vmem:[#allocation5 + $0x178] sm:$0xf0]  ;;  %v1878_v54 = vld [vmem:[#allocation5 + $0x2e4] sm:$0xf]  ;;  %v89_v60 = vld [vmem:[#allocation2 + $0xe8] sm:$0xff] }
  0x45   :  { %1045 = vmatpush.bf16.msrb.mxu3 %v1681_v41  ;;  %v1605_v41 = vor.u32 %v1838_v40, %v1604_v39  ;;  %v1593_v55 = vor.u32 %v1830_v50, %v1590_v51  ;;  %v1782_v56 = vld [vmem:[#allocation5 + $0x2f8] sm:$0xf0]  ;;  %v88_v58 = vld [vmem:[#allocation2 + $0xe0] sm:$0xff]  ;;  %v1833_v63 = vld [vmem:[#allocation5 + $0x174] sm:$0xf0] }
  0x46   :  { %899 = vmatpush.bf16.msrb.mxu0 %v1461_v62  ;;  %v1588_v62 = vld [vmem:[#allocation5 + $0x160] sm:$0xf]  ;;  %v1881_v3 = vld [vmem:[#allocation5 + $0x2f4] sm:$0xf0]  ;;  %v1824_v8 = vld [vmem:[#allocation5 + $0x134] sm:$0xf] }
  0x47   :  { %948 = vmatpush.bf16.msrb.mxu1 %v1653_v1  ;;  %v1780_v0 = vld [vmem:[#allocation5 + $0x2e0] sm:$0xf]  ;;  %v2088_v1 = vpack.c.bf16 %v90_v59, %v88_v58  ;;  %v1589_v2 = vor.u32 %v1833_v63, %v1588_v62  ;;  %v1566_v9 = vld [vmem:[#allocation5 + $0x148] sm:$0xf0]  ;;  %v1872_v10 = vld [vmem:[#allocation5 + $0x2b4] sm:$0xf] }
  0x48   :  { %997 = vmatpush.bf16.msrb.mxu2 %v1465_v57  ;;  %v1785_v57 = vor.u32 %v1878_v54, %v1782_v56  ;;  %v1781_v5 = vor.u32 %v1881_v3, %v1780_v0  ;;  %v1758_v12 = vld [vmem:[#allocation5 + $0x2c8] sm:$0xf0]  ;;  %v2096_v16 = vld [vmem:[#allocation7] sm:$0x3f]  ;;  %v1756_v19 = vld [vmem:[#allocation5 + $0x2b0] sm:$0xf] }
  0x49   :  { %1046 = vmatpush.bf16.msrb.mxu3 %v1657_v61  ;;  %v91_v61 = vld [vmem:[#allocation2 + $0xf8] sm:$0xff]  ;;  %v1761_v13 = vor.u32 %v1872_v10, %v1758_v12  ;;  %v2099_v22 = vperm.slane %v2096_v16, 0  ;;  %v2106_v29 = vperm.slane %v2096_v16, 1  ;;  %v1818_v30 = vld [vmem:[#allocation5 + $0x104] sm:$0xf] }
  0x4a   :  { %900 = vmatpush.bf16.msrb.mxu0 %v1437_v18  ;;  %v2090_v4 = vpack.c.bf16 %v91_v61, %v89_v60  ;;  %v1827_v18 = vld [vmem:[#allocation5 + $0x144] sm:$0xf0]  ;;  %v1866_v34 = vld [vmem:[#allocation5 + $0x284] sm:$0xf]  ;;  %v1540_v51 = vld [vmem:[#allocation5 + $0x100] sm:$0xf] }
  0x4b   :  { %949 = vmatpush.bf16.msrb.mxu1 %v1629_v21  ;;  %v1875_v21 = vld [vmem:[#allocation5 + $0x2c4] sm:$0xf0]  ;;  %v1821_v54 = vld [vmem:[#allocation5 + $0x114] sm:$0xf0]  ;;  %v1860_v12 = vld [vmem:[#allocation5 + $0x254] sm:$0xf] }
  0x4c   :  { %998 = vmatpush.bf16.msrb.mxu2 %v1441_v11  ;;  %v1569_v11 = vor.u32 %v1824_v8, %v1566_v9  ;;  %v1757_v24 = vor.u32 %v1875_v21, %v1756_v19  ;;  %v1541_v56 = vor.u32 %v1821_v54, %v1540_v51  ;;  %v1869_v58 = vld [vmem:[#allocation5 + $0x294] sm:$0xf0]  ;;  %v1812_v8 = vld [vmem:[#allocation5 + $0xd4] sm:$0xf]  ;;  %v1518_v9 = vld [vmem:[#allocation5 + $0xe8] sm:$0xf0] }
  0x4d   :  { %1047 = vmatpush.bf16.msrb.mxu3 %v1633_v17  ;;  %v1564_v17 = vld [vmem:[#allocation5 + $0x130] sm:$0xf]  ;;  %v1806_v51 = vld [vmem:[#allocation5 + $0xa4] sm:$0xf]  ;;  %v1494_v54 = vld [vmem:[#allocation5 + $0xb8] sm:$0xf0] }
  0x4e   :  { %901 = vmatpush.bf16.msrb.mxu0 %v1413_v38  ;;  %v1565_v20 = vor.u32 %v1827_v18, %v1564_v17 }
  0x4f   :  { %950 = vmatpush.bf16.msrb.mxu1 %v1605_v41 }
  0x50   :  { %999 = vmatpush.bf16.msrb.mxu2 %v1417_v31  ;;  %v1542_v31 = vld [vmem:[#allocation5 + $0x118] sm:$0xf0] }
  0x51   :  { %716 = vmatmul.bf16.gmra.mxu0 %v2048_v32  ;;  %1048 = vmatpush.bf16.msrb.mxu3 %v1609_v37  ;;  %v1545_v36 = vor.u32 %v1818_v30, %v1542_v31  ;;  %v1734_v37 = vld [vmem:[#allocation5 + $0x298] sm:$0xf0]  ;;  %v1516_v30 = vld [vmem:[#allocation5 + $0xd0] sm:$0xf]  ;;  %v1815_v31 = vld [vmem:[#allocation5 + $0xe4] sm:$0xf0] }
  0x52   :  { %765 = vmatmul.bf16.gmra.mxu1 %v2050_v33  ;;  %1090 = vmatpush.bf16.msra.mxu0 %v1589_v2  ;;  %v1737_v42 = vor.u32 %v1866_v34, %v1734_v37  ;;  %v1863_v37 = vld [vmem:[#allocation5 + $0x264] sm:$0xf0] }
  0x53   :  { %814 = vmatmul.bf16.gmra.mxu2 %v2048_v32  ;;  %1139 = vmatpush.bf16.msra.mxu1 %v1781_v5 }
  0x54   :  { %863 = vmatmul.bf16.gmra.mxu3 %v2050_v33  ;;  %1188 = vmatpush.bf16.msra.mxu2 %v1593_v55 }
  0x55   :  { %1237 = vmatpush.bf16.msra.mxu3 %v1785_v57  ;;  %v1732_v57 = vld [vmem:[#allocation5 + $0x280] sm:$0xf] }
  0x56   :  { %1091 = vmatpush.bf16.msra.mxu0 %v1565_v20  ;;  %v1733_v62 = vor.u32 %v1869_v58, %v1732_v57  ;;  %v1854_v57 = vld [vmem:[#allocation5 + $0x224] sm:$0xf]  ;;  %v1686_v58 = vld [vmem:[#allocation5 + $0x238] sm:$0xf0] }
  0x57   :  { %1140 = vmatpush.bf16.msra.mxu1 %v1757_v24 }
  0x58   :  { %1189 = vmatpush.bf16.msra.mxu2 %v1569_v11  ;;  %v1521_v11 = vor.u32 %v1812_v8, %v1518_v9  ;;  %v1492_v8 = vld [vmem:[#allocation5 + $0xa0] sm:$0xf]  ;;  %v1809_v9 = vld [vmem:[#allocation5 + $0xb4] sm:$0xf0] }
  0x59   :  { %1238 = vmatpush.bf16.msra.mxu3 %v1761_v13  ;;  %v1710_v13 = vld [vmem:[#allocation5 + $0x268] sm:$0xf0] }
  0x5a   :  { %1092 = vmatpush.bf16.msra.mxu0 %v1541_v56  ;;  %v1713_v21 = vor.u32 %v1860_v12, %v1710_v13  ;;  %v1497_v56 = vor.u32 %v1806_v51, %v1494_v54  ;;  %v1684_v12 = vld [vmem:[#allocation5 + $0x220] sm:$0xf]  ;;  %v1857_v13 = vld [vmem:[#allocation5 + $0x234] sm:$0xf0]  ;;  %v1468_v51 = vld [vmem:[#allocation5 + $0x70] sm:$0xf] }
  0x5b   :  { %1141 = vmatpush.bf16.msra.mxu1 %v1733_v62  ;;  %v1803_v54 = vld [vmem:[#allocation5 + $0x84] sm:$0xf0] }
  0x5c   :  { %1190 = vmatpush.bf16.msra.mxu2 %v1545_v36  ;;  %v1708_v36 = vld [vmem:[#allocation5 + $0x250] sm:$0xf] }
  0x5d   :  { %1239 = vmatpush.bf16.msra.mxu3 %v1737_v42 }
  0x60   :  { %1191 = vmatpush.bf16.msra.mxu2 %v1521_v11  ;;  %v1493_v11 = vor.u32 %v1809_v9, %v1492_v8  ;;  %v1794_v8 = vld [vmem:[#allocation5 + $0x44] sm:$0xf]  ;;  %v1446_v9 = vld [vmem:[#allocation5 + $0x58] sm:$0xf0] }
  0x61   :  { %721 = vmatmul.bf16.gmra.mxu0 %v2056_v52  ;;  %1240 = vmatpush.bf16.msra.mxu3 %v1713_v21 }
  0x62   :  { %770 = vmatmul.bf16.gmra.mxu1 %v2058_v53 }
  0x63   :  { %819 = vmatmul.bf16.gmra.mxu2 %v2056_v52 }
  0x64   :  { %868 = vmatmul.bf16.gmra.mxu3 %v2058_v53  ;;  %1192 = vmatpush.bf16.msra.mxu2 %v1497_v56  ;;  %v1469_v56 = vor.u32 %v1803_v54, %v1468_v51  ;;  %v1788_v51 = vld [vmem:[#allocation5 + $0x14] sm:$0xf]  ;;  %v1422_v54 = vld [vmem:[#allocation5 + $0x28] sm:$0xf0] }
  0x71   :  { %726 = vmatmul.bf16.gmra.mxu0 %v2064_v6 }
  0x72   :  { %775 = vmatmul.bf16.gmra.mxu1 %v2066_v7 }
  0x73   :  { %824 = vmatmul.bf16.gmra.mxu2 %v2064_v6 }
  0x74   :  { %873 = vmatmul.bf16.gmra.mxu3 %v2066_v7 }
  0x81   :  { %731 = vmatmul.bf16.gmra.mxu0 %v2072_v26 }
  0x82   :  { %780 = vmatmul.bf16.gmra.mxu1 %v2074_v27 }
  0x83   :  { %829 = vmatmul.bf16.gmra.mxu2 %v2072_v26 }
  0x84   :  { %878 = vmatmul.bf16.gmra.mxu3 %v2074_v27 }
  0x91   :  { %736 = vmatmul.bf16.gmra.mxu0 %v2080_v47 }
  0x92   :  { %785 = vmatmul.bf16.gmra.mxu1 %v2082_v48 }
  0x93   :  { %834 = vmatmul.bf16.gmra.mxu2 %v2080_v47 }
  0x94   :  { %883 = vmatmul.bf16.gmra.mxu3 %v2082_v48 }
  0xa1   :  { %741 = vmatmul.bf16.gmra.mxu0 %v2088_v1 }
  0xa2   :  { %790 = vmatmul.bf16.gmra.mxu1 %v2090_v4 }
  0xa3   :  { %839 = vmatmul.bf16.gmra.mxu2 %v2088_v1 }
  0xa4   :  { %888 = vmatmul.bf16.gmra.mxu3 %v2090_v4 }
  0xae   :  { %v707_v23 = vpop.f32.mrf.mxu0 }
  0xaf   :  { %v756_v25 = vpop.f32.mrf.mxu1  ;;  %v708_v28 = vadd.f32 %v707_v23, %v2099_v22 }
  0xb1   :  { %902 = vmatmul.bf16.vlgmr.msrb.gmra.mxu0 %v2032_v44  ;;  %v757_v38 = vadd.f32 %v756_v25, %v708_v28 }
  0xb2   :  { %951 = vmatmul.bf16.vlgmr.msrb.gmra.mxu1 %v2034_v49 }
  0xb3   :  { %1000 = vmatmul.bf16.vlgmr.msrb.gmra.mxu2 %v2032_v44 }
  0xb4   :  { %1049 = vmatmul.bf16.vlgmr.msrb.gmra.mxu3 %v2034_v49 }
  0xb6   :  { %v805_v35 = vpop.f32.mrf.mxu2  ;;  %v709_v41 = vpop.f32.mrf.mxu0 }
  0xb7   :  { %v806_v39 = vadd.f32 %v805_v35, %v2106_v29  ;;  %v854_v40 = vpop.f32.mrf.mxu3  ;;  %v758_v43 = vpop.f32.mrf.mxu1  ;;  %v710_v50 = vadd.f32 %v709_v41, %v2099_v22  ;;  %v1517_v35 = vor.u32 %v1815_v31, %v1516_v30  ;;  %v1709_v41 = vor.u32 %v1863_v37, %v1708_v36  ;;  %v1800_v30 = vld [vmem:[#allocation5 + $0x74] sm:$0xf]  ;;  %v1470_v31 = vld [vmem:[#allocation5 + $0x88] sm:$0xf0] }
  0xb8   :  { %v1848_v36 = vld [vmem:[#allocation5 + $0x1f4] sm:$0xf]  ;;  %v1662_v37 = vld [vmem:[#allocation5 + $0x208] sm:$0xf0] }
  0xb9   :  { %v855_v45 = vadd.f32 %v854_v40, %v806_v39  ;;  %v759_v0 = vadd.f32 %v758_v43, %v710_v50  ;;  %1093 = vmatpush.bf16.msra.mxu0 %v1517_v35  ;;  %1142 = vmatpush.bf16.msra.mxu1 %v1709_v41  ;;  %v1473_v35 = vor.u32 %v1800_v30, %v1470_v31  ;;  %v1444_v30 = vld [vmem:[#allocation5 + $0x40] sm:$0xf]  ;;  %v1797_v31 = vld [vmem:[#allocation5 + $0x54] sm:$0xf0] }
  0xbb   :  { %v1286_v46 = vpack.c.bf16 %v855_v45, %v757_v38  ;;  %1193 = vmatpush.bf16.msra.mxu2 %v1473_v35  ;;  %v1445_v35 = vor.u32 %v1797_v31, %v1444_v30 }
  0xbd   :  { %1334 = vst [vmem:[#allocation8] sm:$0xff] %v1286_v46  ;;  %1094 = vmatpush.bf16.msra.mxu0 %v1493_v11  ;;  %v1449_v11 = vor.u32 %v1794_v8, %v1446_v9  ;;  %v1420_v8 = vld [vmem:[#allocation5 + $0x10] sm:$0xf]  ;;  %v1791_v9 = vld [vmem:[#allocation5 + $0x24] sm:$0xf0] }
  0xbe   :  { %v807_v55 = vpop.f32.mrf.mxu2  ;;  %v712_v61 = vpop.f32.mrf.mxu0 }
  0xbf   :  { %v808_v59 = vadd.f32 %v807_v55, %v2106_v29  ;;  %v856_v60 = vpop.f32.mrf.mxu3  ;;  %v761_v63 = vpop.f32.mrf.mxu1  ;;  %v713_v5 = vadd.f32 %v712_v61, %v2099_v22  ;;  %1194 = vmatpush.bf16.msra.mxu2 %v1449_v11  ;;  %v1421_v11 = vor.u32 %v1791_v9, %v1420_v8  ;;  %v2169_v8 = vperm.slane %v2096_v16, 2 }
  0xc1   :  { %v857_v2 = vadd.f32 %v856_v60, %v808_v59  ;;  %907 = vmatmul.bf16.gmra.mxu0 %v2040_v14  ;;  %v762_v17 = vadd.f32 %v761_v63, %v713_v5  ;;  %v1689_v63 = vor.u32 %v1854_v57, %v1686_v58  ;;  %v1660_v57 = vld [vmem:[#allocation5 + $0x1f0] sm:$0xf]  ;;  %v1851_v58 = vld [vmem:[#allocation5 + $0x204] sm:$0xf0] }
  0xc2   :  { %956 = vmatmul.bf16.gmra.mxu1 %v2042_v15  ;;  %1095 = vmatpush.bf16.msra.mxu0 %v1469_v56  ;;  %v1425_v56 = vor.u32 %v1788_v51, %v1422_v54 }
  0xc3   :  { %v1289_v3 = vpack.c.bf16 %v857_v2, %v759_v0  ;;  %1005 = vmatmul.bf16.gmra.mxu2 %v2040_v14  ;;  %1241 = vmatpush.bf16.msra.mxu3 %v1689_v63 }
  0xc4   :  { %1054 = vmatmul.bf16.gmra.mxu3 %v2042_v15  ;;  %1195 = vmatpush.bf16.msra.mxu2 %v1425_v56 }
  0xc5   :  { %1337 = vst [vmem:[#allocation8 + $0x18] sm:$0xff] %v1289_v3 }
  0xc6   :  { %v810_v10 = vpop.f32.mrf.mxu2  ;;  %v714_v20 = vpop.f32.mrf.mxu0  ;;  %1096 = vmatpush.bf16.msra.mxu0 %v1445_v35 }
  0xc7   :  { %v811_v18 = vadd.f32 %v810_v10, %v2106_v29  ;;  %v859_v19 = vpop.f32.mrf.mxu3  ;;  %v763_v23 = vpop.f32.mrf.mxu1  ;;  %v715_v28 = vadd.f32 %v714_v20, %v2099_v22  ;;  %v1685_v20 = vor.u32 %v1857_v13, %v1684_v12  ;;  %v1842_v12 = vld [vmem:[#allocation5 + $0x1c4] sm:$0xf]  ;;  %v1638_v13 = vld [vmem:[#allocation5 + $0x1d8] sm:$0xf0] }
  0xc9   :  { %v860_v24 = vadd.f32 %v859_v19, %v811_v18  ;;  %v764_v43 = vadd.f32 %v763_v23, %v715_v28  ;;  %1143 = vmatpush.bf16.msra.mxu1 %v1685_v20 }
  0xca   :  { %1097 = vmatpush.bf16.msra.mxu0 %v1421_v11 }
  0xcb   :  { %v1292_v25 = vpack.c.bf16 %v860_v24, %v762_v17 }
  0xcd   :  { %1340 = vst [vmem:[#allocation8 + $0x30] sm:$0xff] %v1292_v25 }
  0xce   :  { %v812_v34 = vpop.f32.mrf.mxu2  ;;  %v717_v40 = vpop.f32.mrf.mxu0 }
  0xcf   :  { %v813_v38 = vadd.f32 %v812_v34, %v2106_v29  ;;  %v861_v39 = vpop.f32.mrf.mxu3  ;;  %v766_v42 = vpop.f32.mrf.mxu1  ;;  %v718_v50 = vadd.f32 %v717_v40, %v2099_v22 }
  0xd1   :  { %v862_v45 = vadd.f32 %v861_v39, %v813_v38  ;;  %912 = vmatmul.bf16.gmra.mxu0 %v2048_v32  ;;  %v767_v59 = vadd.f32 %v766_v42, %v718_v50  ;;  %v1665_v42 = vor.u32 %v1848_v36, %v1662_v37  ;;  %v1636_v36 = vld [vmem:[#allocation5 + $0x1c0] sm:$0xf]  ;;  %v1845_v37 = vld [vmem:[#allocation5 + $0x1d4] sm:$0xf0] }
  0xd2   :  { %961 = vmatmul.bf16.gmra.mxu1 %v2050_v33 }
  0xd3   :  { %v1295_v46 = vpack.c.bf16 %v862_v45, %v764_v43  ;;  %1010 = vmatmul.bf16.gmra.mxu2 %v2048_v32  ;;  %1242 = vmatpush.bf16.msra.mxu3 %v1665_v42 }
  0xd4   :  { %1059 = vmatmul.bf16.gmra.mxu3 %v2050_v33 }
  0xd5   :  { %1343 = vst [vmem:[#allocation8 + $0x48] sm:$0xff] %v1295_v46 }
  0xd6   :  { %v815_v55 = vpop.f32.mrf.mxu2  ;;  %v719_v62 = vpop.f32.mrf.mxu0 }
  0xd7   :  { %v816_v60 = vadd.f32 %v815_v55, %v2106_v29  ;;  %v864_v61 = vpop.f32.mrf.mxu3  ;;  %v768_v0 = vpop.f32.mrf.mxu1  ;;  %v720_v5 = vadd.f32 %v719_v62, %v2099_v22  ;;  %v1661_v62 = vor.u32 %v1851_v58, %v1660_v57  ;;  %v1836_v57 = vld [vmem:[#allocation5 + $0x194] sm:$0xf]  ;;  %v1614_v58 = vld [vmem:[#allocation5 + $0x1a8] sm:$0xf0] }
  0xd9   :  { %v865_v2 = vadd.f32 %v864_v61, %v816_v60  ;;  %v769_v23 = vadd.f32 %v768_v0, %v720_v5  ;;  %1144 = vmatpush.bf16.msra.mxu1 %v1661_v62 }
  0xdb   :  { %v1298_v3 = vpack.c.bf16 %v865_v2, %v767_v59 }
  0xdd   :  { %1346 = vst [vmem:[#allocation8 + $0x60] sm:$0xff] %v1298_v3 }
  0xde   :  { %v817_v10 = vpop.f32.mrf.mxu2  ;;  %v722_v19 = vpop.f32.mrf.mxu0 }
  0xdf   :  { %v818_v17 = vadd.f32 %v817_v10, %v2106_v29  ;;  %v866_v18 = vpop.f32.mrf.mxu3  ;;  %v771_v21 = vpop.f32.mrf.mxu1  ;;  %v723_v28 = vadd.f32 %v722_v19, %v2099_v22 }
  0xe1   :  { %v867_v24 = vadd.f32 %v866_v18, %v818_v17  ;;  %917 = vmatmul.bf16.gmra.mxu0 %v2056_v52  ;;  %v772_v38 = vadd.f32 %v771_v21, %v723_v28  ;;  %v1641_v21 = vor.u32 %v1842_v12, %v1638_v13  ;;  %v1612_v12 = vld [vmem:[#allocation5 + $0x190] sm:$0xf]  ;;  %v1839_v13 = vld [vmem:[#allocation5 + $0x1a4] sm:$0xf0] }
  0xe2   :  { %966 = vmatmul.bf16.gmra.mxu1 %v2058_v53 }
  0xe3   :  { %v1301_v25 = vpack.c.bf16 %v867_v24, %v769_v23  ;;  %1015 = vmatmul.bf16.gmra.mxu2 %v2056_v52  ;;  %1243 = vmatpush.bf16.msra.mxu3 %v1641_v21 }
  0xe4   :  { %1064 = vmatmul.bf16.gmra.mxu3 %v2058_v53 }
  0xe5   :  { %1349 = vst [vmem:[#allocation8 + $0x78] sm:$0xff] %v1301_v25 }
  0xe6   :  { %v820_v34 = vpop.f32.mrf.mxu2  ;;  %v724_v41 = vpop.f32.mrf.mxu0 }
  0xe7   :  { %v821_v39 = vadd.f32 %v820_v34, %v2106_v29  ;;  %v869_v40 = vpop.f32.mrf.mxu3  ;;  %v773_v43 = vpop.f32.mrf.mxu1  ;;  %v725_v50 = vadd.f32 %v724_v41, %v2099_v22  ;;  %v1637_v41 = vor.u32 %v1845_v37, %v1636_v36 }
  0xe9   :  { %v870_v45 = vadd.f32 %v869_v40, %v821_v39  ;;  %v774_v0 = vadd.f32 %v773_v43, %v725_v50  ;;  %1145 = vmatpush.bf16.msra.mxu1 %v1637_v41 }
  0xeb   :  { %v1304_v46 = vpack.c.bf16 %v870_v45, %v772_v38 }
  0xed   :  { %1352 = vst [vmem:[#allocation8 + $0x90] sm:$0xff] %v1304_v46 }
  0xee   :  { %v822_v55 = vpop.f32.mrf.mxu2  ;;  %v727_v61 = vpop.f32.mrf.mxu0 }
  0xef   :  { %v823_v59 = vadd.f32 %v822_v55, %v2106_v29  ;;  %v871_v60 = vpop.f32.mrf.mxu3  ;;  %v776_v63 = vpop.f32.mrf.mxu1  ;;  %v728_v5 = vadd.f32 %v727_v61, %v2099_v22 }
  0xf1   :  { %v872_v2 = vadd.f32 %v871_v60, %v823_v59  ;;  %922 = vmatmul.bf16.gmra.mxu0 %v2064_v6  ;;  %v777_v17 = vadd.f32 %v776_v63, %v728_v5  ;;  %v1617_v63 = vor.u32 %v1836_v57, %v1614_v58 }
  0xf2   :  { %971 = vmatmul.bf16.gmra.mxu1 %v2066_v7 }
  0xf3   :  { %v1307_v3 = vpack.c.bf16 %v872_v2, %v774_v0  ;;  %1020 = vmatmul.bf16.gmra.mxu2 %v2064_v6  ;;  %1244 = vmatpush.bf16.msra.mxu3 %v1617_v63 }
  0xf4   :  { %1069 = vmatmul.bf16.gmra.mxu3 %v2066_v7 }
  0xf5   :  { %1355 = vst [vmem:[#allocation8 + $0xa8] sm:$0xff] %v1307_v3 }
  0xf6   :  { %v825_v10 = vpop.f32.mrf.mxu2  ;;  %v729_v20 = vpop.f32.mrf.mxu0 }
  0xf7   :  { %v826_v18 = vadd.f32 %v825_v10, %v2106_v29  ;;  %v874_v19 = vpop.f32.mrf.mxu3  ;;  %v778_v23 = vpop.f32.mrf.mxu1  ;;  %v730_v28 = vadd.f32 %v729_v20, %v2099_v22  ;;  %v1613_v20 = vor.u32 %v1839_v13, %v1612_v12 }
  0xf9   :  { %v875_v24 = vadd.f32 %v874_v19, %v826_v18  ;;  %v779_v43 = vadd.f32 %v778_v23, %v730_v28  ;;  %1146 = vmatpush.bf16.msra.mxu1 %v1613_v20 }
  0xfb   :  { %v1310_v25 = vpack.c.bf16 %v875_v24, %v777_v17 }
  0xfd   :  { %1358 = vst [vmem:[#allocation8 + $0xc0] sm:$0xff] %v1310_v25 }
  0xfe   :  { %v827_v34 = vpop.f32.mrf.mxu2  ;;  %v732_v40 = vpop.f32.mrf.mxu0 }
  0xff   :  { %v828_v38 = vadd.f32 %v827_v34, %v2106_v29  ;;  %v876_v39 = vpop.f32.mrf.mxu3  ;;  %v781_v42 = vpop.f32.mrf.mxu1  ;;  %v733_v50 = vadd.f32 %v732_v40, %v2099_v22 }
 0x101   :  { %v877_v45 = vadd.f32 %v876_v39, %v828_v38  ;;  %927 = vmatmul.bf16.gmra.mxu0 %v2072_v26  ;;  %v782_v59 = vadd.f32 %v781_v42, %v733_v50 }
 0x102   :  { %976 = vmatmul.bf16.gmra.mxu1 %v2074_v27 }
 0x103   :  { %v1313_v46 = vpack.c.bf16 %v877_v45, %v779_v43  ;;  %1025 = vmatmul.bf16.gmra.mxu2 %v2072_v26 }
 0x104   :  { %1074 = vmatmul.bf16.gmra.mxu3 %v2074_v27 }
 0x105   :  { %1361 = vst [vmem:[#allocation8 + $0xd8] sm:$0xff] %v1313_v46 }
 0x106   :  { %v830_v55 = vpop.f32.mrf.mxu2  ;;  %v734_v62 = vpop.f32.mrf.mxu0 }
 0x107   :  { %v831_v60 = vadd.f32 %v830_v55, %v2106_v29  ;;  %v879_v61 = vpop.f32.mrf.mxu3  ;;  %v783_v0 = vpop.f32.mrf.mxu1  ;;  %v735_v5 = vadd.f32 %v734_v62, %v2099_v22 }
 0x109   :  { %v880_v2 = vadd.f32 %v879_v61, %v831_v60  ;;  %v784_v23 = vadd.f32 %v783_v0, %v735_v5 }
 0x10b   :  { %v1316_v3 = vpack.c.bf16 %v880_v2, %v782_v59 }
 0x10d   :  { %1364 = vst [vmem:[#allocation8 + $0xf0] sm:$0xff] %v1316_v3 }
 0x10e   :  { %v832_v10 = vpop.f32.mrf.mxu2  ;;  %v737_v19 = vpop.f32.mrf.mxu0 }
 0x10f   :  { %v833_v17 = vadd.f32 %v832_v10, %v2106_v29  ;;  %v881_v18 = vpop.f32.mrf.mxu3  ;;  %v786_v21 = vpop.f32.mrf.mxu1  ;;  %v738_v28 = vadd.f32 %v737_v19, %v2099_v22 }
 0x111   :  { %v882_v24 = vadd.f32 %v881_v18, %v833_v17  ;;  %932 = vmatmul.bf16.gmra.mxu0 %v2080_v47  ;;  %v787_v31 = vadd.f32 %v786_v21, %v738_v28 }
 0x112   :  { %981 = vmatmul.bf16.gmra.mxu1 %v2082_v48 }
 0x113   :  { %v1319_v25 = vpack.c.bf16 %v882_v24, %v784_v23  ;;  %1030 = vmatmul.bf16.gmra.mxu2 %v2080_v47 }
 0x114   :  { %1079 = vmatmul.bf16.gmra.mxu3 %v2082_v48 }
 0x115   :  { %1367 = vst [vmem:[#allocation8 + $0x108] sm:$0xff] %v1319_v25 }
 0x116   :  { %v835_v30 = vpop.f32.mrf.mxu2  ;;  %v739_v36 = vpop.f32.mrf.mxu0 }
 0x117   :  { %v836_v34 = vadd.f32 %v835_v30, %v2106_v29  ;;  %v884_v35 = vpop.f32.mrf.mxu3  ;;  %v788_v37 = vpop.f32.mrf.mxu1  ;;  %v740_v40 = vadd.f32 %v739_v36, %v2099_v22 }
 0x119   :  { %v885_v38 = vadd.f32 %v884_v35, %v836_v34  ;;  %v789_v50 = vadd.f32 %v788_v37, %v740_v40 }
 0x11b   :  { %v1322_v39 = vpack.c.bf16 %v885_v38, %v787_v31 }
 0x11d   :  { %1370 = vst [vmem:[#allocation8 + $0x120] sm:$0xff] %v1322_v39 }
 0x11e   :  { %v837_v41 = vpop.f32.mrf.mxu2  ;;  %v742_v45 = vpop.f32.mrf.mxu0 }
 0x11f   :  { %v838_v42 = vadd.f32 %v837_v41, %v2106_v29  ;;  %v886_v43 = vpop.f32.mrf.mxu3  ;;  %v791_v46 = vpop.f32.mrf.mxu1  ;;  %v743_v55 = vadd.f32 %v742_v45, %v2099_v22 }
 0x121   :  { %v887_v51 = vadd.f32 %v886_v43, %v838_v42  ;;  %937 = vmatmul.bf16.gmra.mxu0 %v2088_v1  ;;  %v792_v57 = vadd.f32 %v791_v46, %v743_v55 }
 0x122   :  { %986 = vmatmul.bf16.gmra.mxu1 %v2090_v4 }
 0x123   :  { %v1325_v54 = vpack.c.bf16 %v887_v51, %v789_v50  ;;  %1035 = vmatmul.bf16.gmra.mxu2 %v2088_v1 }
 0x124   :  { %1084 = vmatmul.bf16.gmra.mxu3 %v2090_v4 }
 0x125   :  { %1373 = vst [vmem:[#allocation8 + $0x138] sm:$0xff] %v1325_v54 }
 0x126   :  { %v840_v56 = vpop.f32.mrf.mxu2  ;;  %v744_v60 = vpop.f32.mrf.mxu0 }
 0x127   :  { %v841_v58 = vadd.f32 %v840_v56, %v2106_v29  ;;  %v889_v59 = vpop.f32.mrf.mxu3  ;;  %v793_v61 = vpop.f32.mrf.mxu1  ;;  %v745_v0 = vadd.f32 %v744_v60, %v2099_v22  ;;  %v2176_v22 = vperm.slane %v2096_v16, 3 }
 0x129   :  { %v890_v62 = vadd.f32 %v889_v59, %v841_v58  ;;  %v794_v11 = vadd.f32 %v793_v61, %v745_v0 }
 0x12b   :  { %v1328_v63 = vpack.c.bf16 %v890_v62, %v792_v57 }
 0x12d   :  { %1376 = vst [vmem:[#allocation8 + $0x150] sm:$0xff] %v1328_v63 }
 0x12e   :  { %v842_v2 = vpop.f32.mrf.mxu2  ;;  %v903_v9 = vpop.f32.mrf.mxu0 }
 0x12f   :  { %v843_v3 = vadd.f32 %v842_v2, %v2106_v29  ;;  %v891_v5 = vpop.f32.mrf.mxu3  ;;  %v952_v10 = vpop.f32.mrf.mxu1  ;;  %v904_v17 = vadd.f32 %v903_v9, %v2169_v8 }
 0x131   :  { %v892_v12 = vadd.f32 %v891_v5, %v843_v3  ;;  %1098 = vmatmul.bf16.vlgmr.msra.gmra.mxu0 %v2032_v44  ;;  %v953_v18 = vadd.f32 %v952_v10, %v904_v17 }
 0x132   :  { %1147 = vmatmul.bf16.vlgmr.msra.gmra.mxu1 %v2034_v49 }
 0x133   :  { %v1331_v13 = vpack.c.bf16 %v892_v12, %v794_v11  ;;  %1196 = vmatmul.bf16.vlgmr.msra.gmra.mxu2 %v2032_v44 }
 0x134   :  { %1245 = vmatmul.bf16.vlgmr.msra.gmra.mxu3 %v2034_v49 }
 0x135   :  { %1379 = vst [vmem:[#allocation8 + $0x168] sm:$0xff] %v1331_v13 }
 0x136   :  { %v1001_v29 = vpop.f32.mrf.mxu2  ;;  %v905_v21 = vpop.f32.mrf.mxu0 }
 0x137   :  { %v1002_v19 = vadd.f32 %v1001_v29, %v2176_v22  ;;  %v1050_v20 = vpop.f32.mrf.mxu3  ;;  %v954_v23 = vpop.f32.mrf.mxu1  ;;  %v906_v28 = vadd.f32 %v905_v21, %v2169_v8 }
 0x139   :  { %v1051_v24 = vadd.f32 %v1050_v20, %v1002_v19  ;;  %v955_v49 = vadd.f32 %v954_v23, %v906_v28 }
 0x13b   :  { %v1287_v25 = vpack.c.bf16 %v1051_v24, %v953_v18 }
 0x13d   :  { %1335 = vst [vmem:[#allocation8 + $0x8] sm:$0xff] %v1287_v25 }
 0x13e   :  { %v1003_v30 = vpop.f32.mrf.mxu2  ;;  %v908_v34 = vpop.f32.mrf.mxu0 }
 0x13f   :  { %v1004_v44 = vadd.f32 %v1003_v30, %v2176_v22  ;;  %v1052_v31 = vpop.f32.mrf.mxu3  ;;  %v957_v35 = vpop.f32.mrf.mxu1  ;;  %v909_v38 = vadd.f32 %v908_v34, %v2169_v8 }
 0x141   :  { %v1053_v36 = vadd.f32 %v1052_v31, %v1004_v44  ;;  %1103 = vmatmul.bf16.gmra.mxu0 %v2040_v14  ;;  %v958_v40 = vadd.f32 %v957_v35, %v909_v38 }
 0x142   :  { %1152 = vmatmul.bf16.gmra.mxu1 %v2042_v15 }
 0x143   :  { %v1290_v37 = vpack.c.bf16 %v1053_v36, %v955_v49  ;;  %1201 = vmatmul.bf16.gmra.mxu2 %v2040_v14 }
 0x144   :  { %1250 = vmatmul.bf16.gmra.mxu3 %v2042_v15 }
 0x145   :  { %1338 = vst [vmem:[#allocation8 + $0x20] sm:$0xff] %v1290_v37 }
 0x146   :  { %v1006_v39 = vpop.f32.mrf.mxu2  ;;  %v910_v43 = vpop.f32.mrf.mxu0 }
 0x147   :  { %v1007_v41 = vadd.f32 %v1006_v39, %v2176_v22  ;;  %v1055_v42 = vpop.f32.mrf.mxu3  ;;  %v959_v45 = vpop.f32.mrf.mxu1  ;;  %v911_v51 = vadd.f32 %v910_v43, %v2169_v8 }
 0x149   :  { %v1056_v46 = vadd.f32 %v1055_v42, %v1007_v41  ;;  %v960_v15 = vadd.f32 %v959_v45, %v911_v51 }
 0x14b   :  { %v1293_v50 = vpack.c.bf16 %v1056_v46, %v958_v40 }
 0x14d   :  { %1341 = vst [vmem:[#allocation8 + $0x38] sm:$0xff] %v1293_v50 }
 0x14e   :  { %v1008_v54 = vpop.f32.mrf.mxu2  ;;  %v913_v14 = vpop.f32.mrf.mxu0 }
 0x14f   :  { %v1009_v55 = vadd.f32 %v1008_v54, %v2176_v22  ;;  %v1057_v56 = vpop.f32.mrf.mxu3  ;;  %v962_v57 = vpop.f32.mrf.mxu1  ;;  %v914_v60 = vadd.f32 %v913_v14, %v2169_v8 }
 0x151   :  { %v1058_v58 = vadd.f32 %v1057_v56, %v1009_v55  ;;  %1108 = vmatmul.bf16.gmra.mxu0 %v2048_v32  ;;  %v963_v62 = vadd.f32 %v962_v57, %v914_v60 }
 0x152   :  { %1157 = vmatmul.bf16.gmra.mxu1 %v2050_v33 }
 0x153   :  { %v1296_v59 = vpack.c.bf16 %v1058_v58, %v960_v15  ;;  %1206 = vmatmul.bf16.gmra.mxu2 %v2048_v32 }
 0x154   :  { %1255 = vmatmul.bf16.gmra.mxu3 %v2050_v33 }
 0x155   :  { %1344 = vst [vmem:[#allocation8 + $0x50] sm:$0xff] %v1296_v59 }
 0x156   :  { %v1011_v61 = vpop.f32.mrf.mxu2  ;;  %v915_v2 = vpop.f32.mrf.mxu0 }
 0x157   :  { %v1012_v63 = vadd.f32 %v1011_v61, %v2176_v22  ;;  %v1060_v0 = vpop.f32.mrf.mxu3  ;;  %v964_v3 = vpop.f32.mrf.mxu1  ;;  %v916_v10 = vadd.f32 %v915_v2, %v2169_v8 }
 0x159   :  { %v1061_v5 = vadd.f32 %v1060_v0, %v1012_v63  ;;  %v965_v33 = vadd.f32 %v964_v3, %v916_v10 }
 0x15b   :  { %v1299_v9 = vpack.c.bf16 %v1061_v5, %v963_v62 }
 0x15d   :  { %1347 = vst [vmem:[#allocation8 + $0x68] sm:$0xff] %v1299_v9 }
 0x15e   :  { %v1013_v11 = vpop.f32.mrf.mxu2  ;;  %v918_v32 = vpop.f32.mrf.mxu0 }
 0x15f   :  { %v1014_v12 = vadd.f32 %v1013_v11, %v2176_v22  ;;  %v1062_v13 = vpop.f32.mrf.mxu3  ;;  %v967_v17 = vpop.f32.mrf.mxu1  ;;  %v919_v19 = vadd.f32 %v918_v32, %v2169_v8 }
 0x161   :  { %v1063_v29 = vadd.f32 %v1062_v13, %v1014_v12  ;;  %1113 = vmatmul.bf16.gmra.mxu0 %v2056_v52  ;;  %v968_v21 = vadd.f32 %v967_v17, %v919_v19 }
 0x162   :  { %1162 = vmatmul.bf16.gmra.mxu1 %v2058_v53 }
 0x163   :  { %v1302_v18 = vpack.c.bf16 %v1063_v29, %v965_v33  ;;  %1211 = vmatmul.bf16.gmra.mxu2 %v2056_v52 }
 0x164   :  { %1260 = vmatmul.bf16.gmra.mxu3 %v2058_v53 }
 0x165   :  { %1350 = vst [vmem:[#allocation8 + $0x80] sm:$0xff] %v1302_v18 }
 0x166   :  { %v1016_v20 = vpop.f32.mrf.mxu2  ;;  %v920_v25 = vpop.f32.mrf.mxu0 }
 0x167   :  { %v1017_v23 = vadd.f32 %v1016_v20, %v2176_v22  ;;  %v1065_v24 = vpop.f32.mrf.mxu3  ;;  %v969_v28 = vpop.f32.mrf.mxu1  ;;  %v921_v31 = vadd.f32 %v920_v25, %v2169_v8 }
 0x169   :  { %v1066_v30 = vadd.f32 %v1065_v24, %v1017_v23  ;;  %v970_v53 = vadd.f32 %v969_v28, %v921_v31 }
 0x16b   :  { %v1305_v44 = vpack.c.bf16 %v1066_v30, %v968_v21 }
 0x16d   :  { %1353 = vst [vmem:[#allocation8 + $0x98] sm:$0xff] %v1305_v44 }
 0x16e   :  { %v1018_v34 = vpop.f32.mrf.mxu2  ;;  %v923_v52 = vpop.f32.mrf.mxu0 }
 0x16f   :  { %v1019_v35 = vadd.f32 %v1018_v34, %v2176_v22  ;;  %v1067_v49 = vpop.f32.mrf.mxu3  ;;  %v972_v36 = vpop.f32.mrf.mxu1  ;;  %v924_v39 = vadd.f32 %v923_v52, %v2169_v8 }
 0x171   :  { %v1068_v37 = vadd.f32 %v1067_v49, %v1019_v35  ;;  %1118 = vmatmul.bf16.gmra.mxu0 %v2064_v6  ;;  %v973_v41 = vadd.f32 %v972_v36, %v924_v39 }
 0x172   :  { %1167 = vmatmul.bf16.gmra.mxu1 %v2066_v7 }
 0x173   :  { %v1308_v38 = vpack.c.bf16 %v1068_v37, %v970_v53  ;;  %1216 = vmatmul.bf16.gmra.mxu2 %v2064_v6 }
 0x174   :  { %1265 = vmatmul.bf16.gmra.mxu3 %v2066_v7 }
 0x175   :  { %1356 = vst [vmem:[#allocation8 + $0xb0] sm:$0xff] %v1308_v38 }
 0x176   :  { %v1021_v40 = vpop.f32.mrf.mxu2  ;;  %v925_v45 = vpop.f32.mrf.mxu0 }
 0x177   :  { %v1022_v42 = vadd.f32 %v1021_v40, %v2176_v22  ;;  %v1070_v43 = vpop.f32.mrf.mxu3  ;;  %v974_v46 = vpop.f32.mrf.mxu1  ;;  %v926_v54 = vadd.f32 %v925_v45, %v2169_v8 }
 0x179   :  { %v1071_v50 = vadd.f32 %v1070_v43, %v1022_v42  ;;  %v975_v7 = vadd.f32 %v974_v46, %v926_v54 }
 0x17b   :  { %v1311_v51 = vpack.c.bf16 %v1071_v50, %v973_v41 }
 0x17d   :  { %1359 = vst [vmem:[#allocation8 + $0xc8] sm:$0xff] %v1311_v51 }
 0x17e   :  { %v1023_v55 = vpop.f32.mrf.mxu2  ;;  %v928_v6 = vpop.f32.mrf.mxu0 }
 0x17f   :  { %v1024_v56 = vadd.f32 %v1023_v55, %v2176_v22  ;;  %v1072_v14 = vpop.f32.mrf.mxu3  ;;  %v977_v57 = vpop.f32.mrf.mxu1  ;;  %v929_v59 = vadd.f32 %v928_v6, %v2169_v8  ;;  %v2243_v6 = vperm.slane %v2096_v16, 5 }
 0x181   :  { %v1073_v15 = vadd.f32 %v1072_v14, %v1024_v56  ;;  %1123 = vmatmul.bf16.gmra.mxu0 %v2072_v26  ;;  %v978_v61 = vadd.f32 %v977_v57, %v929_v59 }
 0x182   :  { %1172 = vmatmul.bf16.gmra.mxu1 %v2074_v27 }
 0x183   :  { %v1314_v58 = vpack.c.bf16 %v1073_v15, %v975_v7  ;;  %1221 = vmatmul.bf16.gmra.mxu2 %v2072_v26 }
 0x184   :  { %1270 = vmatmul.bf16.gmra.mxu3 %v2074_v27 }
 0x185   :  { %1362 = vst [vmem:[#allocation8 + $0xe0] sm:$0xff] %v1314_v58 }
 0x186   :  { %v1026_v60 = vpop.f32.mrf.mxu2  ;;  %v930_v0 = vpop.f32.mrf.mxu0 }
 0x187   :  { %v1027_v62 = vadd.f32 %v1026_v60, %v2176_v22  ;;  %v1075_v63 = vpop.f32.mrf.mxu3  ;;  %v979_v2 = vpop.f32.mrf.mxu1  ;;  %v931_v9 = vadd.f32 %v930_v0, %v2169_v8 }
 0x189   :  { %v1076_v3 = vadd.f32 %v1075_v63, %v1027_v62  ;;  %v980_v27 = vadd.f32 %v979_v2, %v931_v9 }
 0x18b   :  { %v1317_v5 = vpack.c.bf16 %v1076_v3, %v978_v61 }
 0x18d   :  { %1365 = vst [vmem:[#allocation8 + $0xf8] sm:$0xff] %v1317_v5 }
 0x18e   :  { %v1028_v10 = vpop.f32.mrf.mxu2  ;;  %v933_v26 = vpop.f32.mrf.mxu0 }
 0x18f   :  { %v1029_v11 = vadd.f32 %v1028_v10, %v2176_v22  ;;  %v1077_v12 = vpop.f32.mrf.mxu3  ;;  %v982_v13 = vpop.f32.mrf.mxu1  ;;  %v934_v33 = vadd.f32 %v933_v26, %v2169_v8 }
 0x191   :  { %v1078_v32 = vadd.f32 %v1077_v12, %v1029_v11  ;;  %1128 = vmatmul.bf16.gmra.mxu0 %v2080_v47  ;;  %v983_v18 = vadd.f32 %v982_v13, %v934_v33 }
 0x192   :  { %1177 = vmatmul.bf16.gmra.mxu1 %v2082_v48 }
 0x193   :  { %v1320_v17 = vpack.c.bf16 %v1078_v32, %v980_v27  ;;  %1226 = vmatmul.bf16.gmra.mxu2 %v2080_v47 }
 0x194   :  { %1275 = vmatmul.bf16.gmra.mxu3 %v2082_v48 }
 0x195   :  { %1368 = vst [vmem:[#allocation8 + $0x110] sm:$0xff] %v1320_v17 }
 0x196   :  { %v1031_v29 = vpop.f32.mrf.mxu2  ;;  %v935_v21 = vpop.f32.mrf.mxu0 }
 0x197   :  { %v1032_v19 = vadd.f32 %v1031_v29, %v2176_v22  ;;  %v1080_v20 = vpop.f32.mrf.mxu3  ;;  %v984_v23 = vpop.f32.mrf.mxu1  ;;  %v936_v28 = vadd.f32 %v935_v21, %v2169_v8 }
 0x199   :  { %v1081_v24 = vadd.f32 %v1080_v20, %v1032_v19  ;;  %v985_v48 = vadd.f32 %v984_v23, %v936_v28 }
 0x19b   :  { %v1323_v25 = vpack.c.bf16 %v1081_v24, %v983_v18 }
 0x19d   :  { %1371 = vst [vmem:[#allocation8 + $0x128] sm:$0xff] %v1323_v25 }
 0x19e   :  { %v1033_v30 = vpop.f32.mrf.mxu2  ;;  %v938_v47 = vpop.f32.mrf.mxu0 }
 0x19f   :  { %v1034_v44 = vadd.f32 %v1033_v30, %v2176_v22  ;;  %v1082_v31 = vpop.f32.mrf.mxu3  ;;  %v987_v34 = vpop.f32.mrf.mxu1  ;;  %v939_v52 = vadd.f32 %v938_v47, %v2169_v8 }
 0x1a1   :  { %v1083_v35 = vadd.f32 %v1082_v31, %v1034_v44  ;;  %1133 = vmatmul.bf16.gmra.mxu0 %v2088_v1  ;;  %v988_v53 = vadd.f32 %v987_v34, %v939_v52 }
 0x1a2   :  { %1182 = vmatmul.bf16.gmra.mxu1 %v2090_v4 }
 0x1a3   :  { %v1326_v49 = vpack.c.bf16 %v1083_v35, %v985_v48  ;;  %1231 = vmatmul.bf16.gmra.mxu2 %v2088_v1  ;;  %v2239_v1 = vperm.slane %v2096_v16, 4 }
 0x1a4   :  { %1280 = vmatmul.bf16.gmra.mxu3 %v2090_v4 }
 0x1a5   :  { %1374 = vst [vmem:[#allocation8 + $0x140] sm:$0xff] %v1326_v49 }
 0x1a6   :  { %v1036_v36 = vpop.f32.mrf.mxu2  ;;  %v940_v39 = vpop.f32.mrf.mxu0 }
 0x1a7   :  { %v1037_v37 = vadd.f32 %v1036_v36, %v2176_v22  ;;  %v1085_v38 = vpop.f32.mrf.mxu3  ;;  %v989_v40 = vpop.f32.mrf.mxu1  ;;  %v941_v43 = vadd.f32 %v940_v39, %v2169_v8 }
 0x1a9   :  { %v1086_v41 = vadd.f32 %v1085_v38, %v1037_v37  ;;  %v990_v54 = vadd.f32 %v989_v40, %v941_v43 }
 0x1ab   :  { %v1329_v42 = vpack.c.bf16 %v1086_v41, %v988_v53 }
 0x1ad   :  { %1377 = vst [vmem:[#allocation8 + $0x158] sm:$0xff] %v1329_v42 }
 0x1ae   :  { %v1038_v45 = vpop.f32.mrf.mxu2  ;;  %v1099_v4 = vpop.f32.mrf.mxu0 }
 0x1af   :  { %v1039_v46 = vadd.f32 %v1038_v45, %v2176_v22  ;;  %v1087_v50 = vpop.f32.mrf.mxu3  ;;  %v1148_v51 = vpop.f32.mrf.mxu1  ;;  %v1100_v14 = vadd.f32 %v1099_v4, %v2239_v1 }
 0x1b1   :  { %v1088_v55 = vadd.f32 %v1087_v50, %v1039_v46  ;;  %v1149_v8 = vadd.f32 %v1148_v51, %v1100_v14 }
 0x1b3   :  { %v1332_v56 = vpack.c.bf16 %v1088_v55, %v990_v54 }
 0x1b5   :  { %1380 = vst [vmem:[#allocation8 + $0x170] sm:$0xff] %v1332_v56 }
 0x1b6   :  { %v1197_v57 = vpop.f32.mrf.mxu2  ;;  %v1101_v15 = vpop.f32.mrf.mxu0 }
 0x1b7   :  { %v1198_v7 = vadd.f32 %v1197_v57, %v2243_v6  ;;  %v1246_v22 = vpop.f32.mrf.mxu3  ;;  %v1150_v58 = vpop.f32.mrf.mxu1  ;;  %v1102_v61 = vadd.f32 %v1101_v15, %v2239_v1 }
 0x1b9   :  { %v1247_v59 = vadd.f32 %v1246_v22, %v1198_v7  ;;  %v1151_v3 = vadd.f32 %v1150_v58, %v1102_v61 }
 0x1bb   :  { %v1288_v60 = vpack.c.bf16 %v1247_v59, %v1149_v8 }
 0x1bd   :  { %1336 = vst [vmem:[#allocation8 + $0x10] sm:$0xff] %v1288_v60 }
 0x1be   :  { %v1199_v62 = vpop.f32.mrf.mxu2  ;;  %v1104_v2 = vpop.f32.mrf.mxu0 }
 0x1bf   :  { %v1200_v63 = vadd.f32 %v1199_v62, %v2243_v6  ;;  %v1248_v0 = vpop.f32.mrf.mxu3  ;;  %v1153_v16 = vpop.f32.mrf.mxu1  ;;  %v1105_v10 = vadd.f32 %v1104_v2, %v2239_v1 }
 0x1c1   :  { %v1249_v5 = vadd.f32 %v1248_v0, %v1200_v63  ;;  %v1154_v12 = vadd.f32 %v1153_v16, %v1105_v10 }
 0x1c3   :  { %v1291_v9 = vpack.c.bf16 %v1249_v5, %v1151_v3 }
 0x1c5   :  { %1339 = vst [vmem:[#allocation8 + $0x28] sm:$0xff] %v1291_v9 }
 0x1c6   :  { %v1202_v11 = vpop.f32.mrf.mxu2  ;;  %v1106_v27 = vpop.f32.mrf.mxu0 }
 0x1c7   :  { %v1203_v26 = vadd.f32 %v1202_v11, %v2243_v6  ;;  %v1251_v13 = vpop.f32.mrf.mxu3  ;;  %v1155_v32 = vpop.f32.mrf.mxu1  ;;  %v1107_v29 = vadd.f32 %v1106_v27, %v2239_v1 }
 0x1c9   :  { %v1252_v17 = vadd.f32 %v1251_v13, %v1203_v26  ;;  %v1156_v24 = vadd.f32 %v1155_v32, %v1107_v29 }
 0x1cb   :  { %v1294_v33 = vpack.c.bf16 %v1252_v17, %v1154_v12 }
 0x1cd   :  { %1342 = vst [vmem:[#allocation8 + $0x40] sm:$0xff] %v1294_v33 }
 0x1ce   :  { %v1204_v18 = vpop.f32.mrf.mxu2  ;;  %v1109_v21 = vpop.f32.mrf.mxu0 }
 0x1cf   :  { %v1205_v19 = vadd.f32 %v1204_v18, %v2243_v6  ;;  %v1253_v20 = vpop.f32.mrf.mxu3  ;;  %v1158_v23 = vpop.f32.mrf.mxu1  ;;  %v1110_v30 = vadd.f32 %v1109_v21, %v2239_v1 }
 0x1d1   :  { %v1254_v25 = vadd.f32 %v1253_v20, %v1205_v19  ;;  %v1159_v31 = vadd.f32 %v1158_v23, %v1110_v30 }
 0x1d3   :  { %v1297_v28 = vpack.c.bf16 %v1254_v25, %v1156_v24 }
 0x1d5   :  { %1345 = vst [vmem:[#allocation8 + $0x58] sm:$0xff] %v1297_v28 }
 0x1d6   :  { %v1207_v44 = vpop.f32.mrf.mxu2  ;;  %v1111_v48 = vpop.f32.mrf.mxu0 }
 0x1d7   :  { %v1208_v47 = vadd.f32 %v1207_v44, %v2243_v6  ;;  %v1256_v34 = vpop.f32.mrf.mxu3  ;;  %v1160_v35 = vpop.f32.mrf.mxu1  ;;  %v1112_v36 = vadd.f32 %v1111_v48, %v2239_v1 }
 0x1d9   :  { %v1257_v49 = vadd.f32 %v1256_v34, %v1208_v47  ;;  %v1161_v41 = vadd.f32 %v1160_v35, %v1112_v36 }
 0x1db   :  { %v1300_v52 = vpack.c.bf16 %v1257_v49, %v1159_v31 }
 0x1dd   :  { %1348 = vst [vmem:[#allocation8 + $0x70] sm:$0xff] %v1300_v52 }
 0x1de   :  { %v1209_v53 = vpop.f32.mrf.mxu2  ;;  %v1114_v39 = vpop.f32.mrf.mxu0 }
 0x1df   :  { %v1210_v37 = vadd.f32 %v1209_v53, %v2243_v6  ;;  %v1258_v38 = vpop.f32.mrf.mxu3  ;;  %v1163_v40 = vpop.f32.mrf.mxu1  ;;  %v1115_v45 = vadd.f32 %v1114_v39, %v2239_v1 }
 0x1e1   :  { %v1259_v42 = vadd.f32 %v1258_v38, %v1210_v37  ;;  %v1164_v50 = vadd.f32 %v1163_v40, %v1115_v45 }
 0x1e3   :  { %v1303_v43 = vpack.c.bf16 %v1259_v42, %v1161_v41 }
 0x1e5   :  { %1351 = vst [vmem:[#allocation8 + $0x88] sm:$0xff] %v1303_v43 }
 0x1e6   :  { %v1212_v46 = vpop.f32.mrf.mxu2  ;;  %v1116_v54 = vpop.f32.mrf.mxu0 }
 0x1e7   :  { %v1213_v4 = vadd.f32 %v1212_v46, %v2243_v6  ;;  %v1261_v51 = vpop.f32.mrf.mxu3  ;;  %v1165_v55 = vpop.f32.mrf.mxu1  ;;  %v1117_v57 = vadd.f32 %v1116_v54, %v2239_v1 }
 0x1e9   :  { %v1262_v56 = vadd.f32 %v1261_v51, %v1213_v4  ;;  %v1166_v59 = vadd.f32 %v1165_v55, %v1117_v57 }
 0x1eb   :  { %v1306_v14 = vpack.c.bf16 %v1262_v56, %v1164_v50 }
 0x1ed   :  { %1354 = vst [vmem:[#allocation8 + $0xa0] sm:$0xff] %v1306_v14 }
 0x1ee   :  { %v1214_v8 = vpop.f32.mrf.mxu2  ;;  %v1119_v15 = vpop.f32.mrf.mxu0 }
 0x1ef   :  { %v1215_v7 = vadd.f32 %v1214_v8, %v2243_v6  ;;  %v1263_v22 = vpop.f32.mrf.mxu3  ;;  %v1168_v58 = vpop.f32.mrf.mxu1  ;;  %v1120_v62 = vadd.f32 %v1119_v15, %v2239_v1 }
 0x1f1   :  { %v1264_v60 = vadd.f32 %v1263_v22, %v1215_v7  ;;  %v1169_v0 = vadd.f32 %v1168_v58, %v1120_v62 }
 0x1f3   :  { %v1309_v61 = vpack.c.bf16 %v1264_v60, %v1166_v59 }
 0x1f5   :  { %1357 = vst [vmem:[#allocation8 + $0xb8] sm:$0xff] %v1309_v61 }
 0x1f6   :  { %v1217_v63 = vpop.f32.mrf.mxu2  ;;  %v1121_v3 = vpop.f32.mrf.mxu0 }
 0x1f7   :  { %v1218_v2 = vadd.f32 %v1217_v63, %v2243_v6  ;;  %v1266_v16 = vpop.f32.mrf.mxu3  ;;  %v1170_v5 = vpop.f32.mrf.mxu1  ;;  %v1122_v11 = vadd.f32 %v1121_v3, %v2239_v1 }
 0x1f9   :  { %v1267_v9 = vadd.f32 %v1266_v16, %v1218_v2  ;;  %v1171_v17 = vadd.f32 %v1170_v5, %v1122_v11 }
 0x1fb   :  { %v1312_v10 = vpack.c.bf16 %v1267_v9, %v1169_v0 }
 0x1fd   :  { %1360 = vst [vmem:[#allocation8 + $0xd0] sm:$0xff] %v1312_v10 }
 0x1fe   :  { %v1219_v12 = vpop.f32.mrf.mxu2  ;;  %v1124_v27 = vpop.f32.mrf.mxu0 }
 0x1ff   :  { %v1220_v26 = vadd.f32 %v1219_v12, %v2243_v6  ;;  %v1268_v13 = vpop.f32.mrf.mxu3  ;;  %v1173_v32 = vpop.f32.mrf.mxu1  ;;  %v1125_v18 = vadd.f32 %v1124_v27, %v2239_v1 }
 0x201   :  { %v1269_v33 = vadd.f32 %v1268_v13, %v1220_v26  ;;  %v1174_v20 = vadd.f32 %v1173_v32, %v1125_v18 }
 0x203   :  { %v1315_v29 = vpack.c.bf16 %v1269_v33, %v1171_v17 }
 0x205   :  { %1363 = vst [vmem:[#allocation8 + $0xe8] sm:$0xff] %v1315_v29 }
 0x206   :  { %v1222_v19 = vpop.f32.mrf.mxu2  ;;  %v1126_v24 = vpop.f32.mrf.mxu0 }
 0x207   :  { %v1223_v21 = vadd.f32 %v1222_v19, %v2243_v6  ;;  %v1271_v23 = vpop.f32.mrf.mxu3  ;;  %v1175_v25 = vpop.f32.mrf.mxu1  ;;  %v1127_v44 = vadd.f32 %v1126_v24, %v2239_v1 }
 0x209   :  { %v1272_v28 = vadd.f32 %v1271_v23, %v1223_v21  ;;  %v1176_v35 = vadd.f32 %v1175_v25, %v1127_v44 }
 0x20b   :  { %v1318_v30 = vpack.c.bf16 %v1272_v28, %v1174_v20 }
 0x20d   :  { %1366 = vst [vmem:[#allocation8 + $0x100] sm:$0xff] %v1318_v30 }
 0x20e   :  { %v1224_v31 = vpop.f32.mrf.mxu2  ;;  %v1129_v48 = vpop.f32.mrf.mxu0 }
 0x20f   :  { %v1225_v47 = vadd.f32 %v1224_v31, %v2243_v6  ;;  %v1273_v34 = vpop.f32.mrf.mxu3  ;;  %v1178_v52 = vpop.f32.mrf.mxu1  ;;  %v1130_v53 = vadd.f32 %v1129_v48, %v2239_v1 }
 0x211   :  { %v1274_v49 = vadd.f32 %v1273_v34, %v1225_v47  ;;  %v1179_v38 = vadd.f32 %v1178_v52, %v1130_v53 }
 0x213   :  { %v1321_v36 = vpack.c.bf16 %v1274_v49, %v1176_v35 }
 0x215   :  { %1369 = vst [vmem:[#allocation8 + $0x118] sm:$0xff] %v1321_v36 }
 0x216   :  { %v1227_v37 = vpop.f32.mrf.mxu2  ;;  %v1131_v41 = vpop.f32.mrf.mxu0 }
 0x217   :  { %v1228_v39 = vadd.f32 %v1227_v37, %v2243_v6  ;;  %v1276_v40 = vpop.f32.mrf.mxu3  ;;  %v1180_v45 = vpop.f32.mrf.mxu1  ;;  %v1132_v46 = vadd.f32 %v1131_v41, %v2239_v1 }
 0x219   :  { %v1277_v42 = vadd.f32 %v1276_v40, %v1228_v39  ;;  %v1181_v55 = vadd.f32 %v1180_v45, %v1132_v46 }
 0x21b   :  { %v1324_v43 = vpack.c.bf16 %v1277_v42, %v1179_v38 }
 0x21d   :  { %1372 = vst [vmem:[#allocation8 + $0x130] sm:$0xff] %v1324_v43 }
 0x21e   :  { %v1229_v50 = vpop.f32.mrf.mxu2  ;;  %v1134_v54 = vpop.f32.mrf.mxu0 }
 0x21f   :  { %v1230_v4 = vadd.f32 %v1229_v50, %v2243_v6  ;;  %v1278_v51 = vpop.f32.mrf.mxu3  ;;  %v1135_v57 = vadd.f32 %v1134_v54, %v2239_v1  ;;  %v1183_v8 = vpop.f32.mrf.mxu1 }
 0x221   :  { %v1279_v56 = vadd.f32 %v1278_v51, %v1230_v4  ;;  %v1184_v22 = vadd.f32 %v1183_v8, %v1135_v57 }
 0x223   :  { %v1327_v14 = vpack.c.bf16 %v1279_v56, %v1181_v55 }
 0x225   :  { %1375 = vst [vmem:[#allocation8 + $0x148] sm:$0xff] %v1327_v14 }
 0x226   :  { %v1232_v7 = vpop.f32.mrf.mxu2  ;;  %v1136_v60 = vpop.f32.mrf.mxu0 }
 0x227   :  { %v1233_v15 = vadd.f32 %v1232_v7, %v2243_v6  ;;  %v1281_v58 = vpop.f32.mrf.mxu3  ;;  %v1137_v62 = vadd.f32 %v1136_v60, %v2239_v1  ;;  %v1185_v2 = vpop.f32.mrf.mxu1 }
 0x229   :  { %v1282_v59 = vadd.f32 %v1281_v58, %v1233_v15  ;;  %v1186_v3 = vadd.f32 %v1185_v2, %v1137_v62 }
 0x22b   :  { %v1330_v61 = vpack.c.bf16 %v1282_v59, %v1184_v22 }
 0x22d   :  { %1378 = vst [vmem:[#allocation8 + $0x160] sm:$0xff] %v1330_v61 }
 0x22e   :  { %v1234_v63 = vpop.f32.mrf.mxu2 }
 0x22f   :  { %v1235_v0 = vadd.f32 %v1234_v63, %v2243_v6  ;;  %v1283_v16 = vpop.f32.mrf.mxu3 }
 0x231   :  { %v1284_v5 = vadd.f32 %v1283_v16, %v1235_v0 }
 0x233   :  { %v1333_v9 = vpack.c.bf16 %v1284_v5, %v1186_v3 }
 0x235   :  { %1381 = vst [vmem:[#allocation8 + $0x178] sm:$0xff] %v1333_v9 }
 0x236   :  { %1394 = dma.vmem_to_hbm [thread:$0]  %s1387_s29, 6144, %s1389_s5, [#allocation4], %s1993_s20, %s1993_s20, %s1994_s21  }
 0x237   :  { %1990 = dma.done.wait [#allocation4], 6144  }
 0x238   :  { %1991 = vsyncadd [#allocation4], 4294961152 }
 0x239   :  { %1399 = vsyncpa [#allocation3], 1 }
 0x23a   :  { %1400 = vsyncpa [#allocation6], 1 }
 0x23b   :  { %1401 = vsyncpa [#allocation4], 1 }

</bundles_post_ra>
